<compile_context>
chip_gen: v6e
topology: v6e:2x2x1
jax: 0.10.0
libtpu: 0.0.40
codegen_flags: <defaults>
</compile_context>

<pallas_src>
import jax
import jax.numpy as jnp
from jax.experimental import pallas as pl
from jax.experimental.pallas import tpu as pltpu

_EPS = 1e-5      # nn.BatchNorm2d default eps
_LANE = 128


def _round_up(x, m):
    return (x + m - 1) // m * m


def _pick_tile(extent, target):
    """Largest divisor of `extent` that is <= target (>= 1)."""
    t = max(1, min(target, extent))
    while extent % t:
        t -= 1
    return t


def _im2col(x_nhwc, ksize, stride, pad, k_pad):
    """(N,H,W,C) -> (N*Ho*Wo, k_pad) patches, (dy,dx,cin) column order."""
    N, H, W, C = x_nhwc.shape
    xp = jnp.pad(x_nhwc, ((0, 0), (pad, pad), (pad, pad), (0, 0)))
    Ho = (H + 2 * pad - ksize) // stride + 1
    Wo = (W + 2 * pad - ksize) // stride + 1
    cols = []
    for dy in range(ksize):
        for dx in range(ksize):
            cols.append(xp[:, dy:dy + stride * Ho:stride,
                            dx:dx + stride * Wo:stride, :])
    patches = jnp.concatenate(cols, axis=-1).reshape(N * Ho * Wo,
                                                     ksize * ksize * C)
    return jnp.pad(patches, ((0, 0), (0, k_pad - ksize * ksize * C))), Ho, Wo


def _conv1_ds_weight(w1, wds, cin, cp, k1p):
    """Fused (K1p, 2*Cp) weight: cols [0,Cp)=conv1 3x3, cols [Cp,2Cp)=ds 1x1
    placed on the centre-tap rows.  Zero rows/cols meet zero-padded patch
    columns / lanes, so they contribute nothing."""
    co = w1.shape[0]
    w1m = jnp.transpose(w1, (2, 3, 1, 0)).reshape(9 * cin, co)
    w1m = jnp.pad(w1m, ((0, k1p - 9 * cin), (0, cp - co)))
    wdsm = wds[:, :, 0, 0].T                                  # (Cin, Cout)
    wdsm = jnp.pad(wdsm, ((4 * cin, k1p - 5 * cin), (0, cp - co)))
    return jnp.concatenate([w1m, wdsm], axis=1)


def _conv2_weight(w2, cp):
    """(Cout,Cin,3,3) -> (9*Cp, Cp), tap-major rows matching the in-kernel
    im2col lane order (t = dy*3+dx, then cin)."""
    co, ci, _, _ = w2.shape
    m = jnp.transpose(w2, (2, 3, 1, 0)).reshape(9, ci, co)
    m = jnp.pad(m, ((0, 0), (0, cp - ci), (0, cp - co)))
    return m.reshape(9 * cp, cp)


def _bn_affine(s, cnt, gamma, beta):
    # s: (2, C) = [sum, sum_sq].  TODO(synk): E[x^2]-E[x]^2 in f32 can cancel
    # for large-mean activations; fine at these (post-conv, O(1)) scales.
    mean = s[0] / cnt
    var = jnp.maximum(s[1] / cnt - mean * mean, 0.0)
    scale = gamma * jax.lax.rsqrt(var + _EPS)
    shift = beta - mean * scale
    return jnp.stack([scale, shift], axis=0)


def conv_res_block(x_nchw, p, *, tile_h1=8, tile_h2=8):
    """ConvResBlock forward (training-mode BN).  NCHW in / NCHW out."""
    N, Cin, H, W = x_nchw.shape
    Cout = p["w1"].shape[0]
    Cp = _round_up(Cout, _LANE)               # lane-dense channel dim
    K1p = _round_up(9 * Cin, _LANE)           # lane-dense patch dim

    x = jnp.transpose(x_nchw, (0, 2, 3, 1)).astype(jnp.float32)   # NHWC

    p1, Ho, Wo = _im2col(x, 3, 2, 1, K1p)
    p1 = p1.astype(jnp.bfloat16)              # (rows, K1p)
    rows = N * Ho * Wo
    Wp = Wo + 2                               # W-padded width for conv2

    th1 = _pick_tile(Ho, tile_h1)             # conv1/apply1 rows per tile
    th2 = _pick_tile(Ho, tile_h2)             # conv2 output rows per tile
    T1, T2 = Ho // th1, Ho // th2
    tm = th1 * Wo                             # flat conv1 rows per tile
    # NOTE: Wo % 8 == 0 keeps the in-kernel (th, Wo, Cp)<->(th*Wo, Cp)
    # reshapes layout-trivial (true for the dSprites-style sizes used here).

    w1c = _conv1_ds_weight(p["w1"], p["wds"], Cin, Cp, K1p).astype(jnp.bfloat16)
    w2f = _conv2_weight(p["w2"], Cp).astype(jnp.bfloat16)

    def padc(v):
        # gamma MUST be zero-padded past Cout so padded lanes stay exactly 0
        # through conv2 and the residual add.
        return jnp.pad(v.astype(jnp.float32), (0, Cp - Cout))

    g1c = jnp.concatenate([padc(p["bn1_gamma"]), padc(p["bnds_gamma"])])
    b1c = jnp.concatenate([padc(p["bn1_beta"]), padc(p["bnds_beta"])])
    g2, b2 = padc(p["bn2_gamma"]), padc(p["bn2_beta"])

    cnt = float(rows)
    smem_spec = pl.BlockSpec(memory_space=pltpu.MemorySpace.SMEM)
    par2 = pltpu.CompilerParams(dimension_semantics=("parallel", "parallel"))

    # ============ conv1 + ds: one fused matmul, stats + z cache ============
    def stats1_kernel(p_ref, w_ref, zc_ref, st_ref):
        z = jnp.dot(p_ref[...], w_ref[...], preferred_element_type=jnp.float32)
        zc_ref[...] = z.astype(jnp.bfloat16)
        # No valid-row mask: zero-padded patch rows/cols contribute 0 to both
        # sums because no bias is added in-kernel.
        st_ref[...] = jnp.concatenate(
            [jnp.sum(z, axis=0, keepdims=True),
             jnp.sum(z * z, axis=0, keepdims=True),
             jnp.zeros((6, 2 * Cp), jnp.float32)], axis=0)[None]

    zc, st1 = pl.pallas_call(
        stats1_kernel,
        grid=(N, T1),
        in_specs=[pl.BlockSpec((tm, K1p), lambda n, j: (n * T1 + j, 0)),
                  pl.BlockSpec((K1p, 2 * Cp), lambda n, j: (0, 0))],
        out_specs=(pl.BlockSpec((tm, 2 * Cp), lambda n, j: (n * T1 + j, 0)),
                   pl.BlockSpec((1, 8, 2 * Cp), lambda n, j: (n * T1 + j, 0, 0))),
        out_shape=(jax.ShapeDtypeStruct((rows, 2 * Cp), jnp.bfloat16),
                   jax.ShapeDtypeStruct((N * T1, 8, 2 * Cp), jnp.float32)),
        compiler_params=par2,
    )(p1, w1c)

    aff1 = _bn_affine(jnp.sum(st1, axis=0)[:2], cnt, g1c, b1c)   # (2, 2Cp)

    # ====== apply1: elementwise BN affine + PReLU; h1 written W-padded =====
    zc4 = zc.reshape(N, Ho, Wo, 2 * Cp)        # pure metadata reshape

    def apply1_kernel(zc_ref, aff_ref, a_ref, h1_ref, skip_ref):
        z = zc_ref[...].astype(jnp.float32)                 # (1,th1,Wo,2Cp)
        aff = aff_ref[...]
        y = z * aff[0] + aff[1]
        y1, ys = y[..., :Cp], y[..., Cp:]
        alpha1 = a_ref[0, 0]
        h1 = jnp.where(y1 > 0, y1, alpha1 * y1)
        zcol = jnp.zeros((1, th1, 1, Cp), jnp.float32)
        h1_ref[...] = jnp.concatenate([zcol, h1, zcol],
                                      axis=2).astype(jnp.bfloat16)
        skip_ref[...] = ys.astype(jnp.bfloat16)

    h1p, skip = pl.pallas_call(
        apply1_kernel,
        grid=(N, T1),
        in_specs=[pl.BlockSpec((1, th1, Wo, 2 * Cp), lambda n, j: (n, j, 0, 0)),
                  pl.BlockSpec((2, 2 * Cp), lambda n, j: (0, 0)),
                  smem_spec],
        out_specs=(pl.BlockSpec((1, th1, Wp, Cp), lambda n, j: (n, j, 0, 0)),
                   pl.BlockSpec((1, th1, Wo, Cp), lambda n, j: (n, j, 0, 0))),
        out_shape=(jax.ShapeDtypeStruct((N, Ho, Wp, Cp), jnp.bfloat16),
                   jax.ShapeDtypeStruct((N, Ho, Wo, Cp), jnp.bfloat16)),
        compiler_params=par2,
    )(zc4, aff1, p["alpha1"].reshape(1, 1))

    # == conv2 (3x3/s1/p1): th2-row tiles, 2-row halo, single K=9*Cp matmul ==
    def conv2_tile(body_ref, top_ref, bot_ref, w_ref):
        j = pl.program_id(1)
        tmask = (j > 0).astype(jnp.float32)          # top halo is zero-pad @ j=0
        bmask = (j < T2 - 1).astype(jnp.float32)     # bottom halo zero-pad @ last
        top = top_ref[0].astype(jnp.float32) * tmask
        bot = bot_ref[0].astype(jnp.float32) * bmask
        body = body_ref[0].astype(jnp.float32)
        win = jnp.concatenate([top, body, bot], axis=0)      # (th2+2, Wp, Cp)
        cols = []
        for dy in range(3):
            for dx in range(3):
                cols.append(win[dy:dy + th2, dx:dx + Wo, :]
                            .reshape(th2 * Wo, Cp))
        patches = jnp.concatenate(cols, axis=-1).astype(jnp.bfloat16)
        return jnp.dot(patches, w_ref[...],
                       preferred_element_type=jnp.float32)   # (th2*Wo, Cp)

    def stats2_kernel(body_ref, top_ref, bot_ref, w_ref, zc_ref, st_ref):
        z = conv2_tile(body_ref, top_ref, bot_ref, w_ref)
        zc_ref[...] = z.reshape(1, th2, Wo, Cp).astype(jnp.bfloat16)
        st_ref[...] = jnp.concatenate(
            [jnp.sum(z, axis=0, keepdims=True),
             jnp.sum(z * z, axis=0, keepdims=True),
             jnp.zeros((6, Cp), jnp.float32)], axis=0)[None]

    body_spec = pl.BlockSpec((1, th2, Wp, Cp), lambda n, j: (n, j, 0, 0))
    top_spec = pl.BlockSpec(
        (1, 1, Wp, Cp), lambda n, j: (n, jnp.maximum(j * th2 - 1, 0), 0, 0))
    bot_spec = pl.BlockSpec(
        (1, 1, Wp, Cp), lambda n, j: (n, jnp.minimum((j + 1) * th2, Ho - 1), 0, 0))
    w2_spec = pl.BlockSpec((9 * Cp, Cp), lambda n, j: (0, 0))

    z2, st2 = pl.pallas_call(
        stats2_kernel,
        grid=(N, T2),
        in_specs=[body_spec, top_spec, bot_spec, w2_spec],
        out_specs=(pl.BlockSpec((1, th2, Wo, Cp), lambda n, j: (n, j, 0, 0)),
                   pl.BlockSpec((1, 8, Cp), lambda n, j: (n * T2 + j, 0, 0))),
        out_shape=(jax.ShapeDtypeStruct((N, Ho, Wo, Cp), jnp.bfloat16),
                   jax.ShapeDtypeStruct((N * T2, 8, Cp), jnp.float32)),
        compiler_params=par2,
    )(h1p, h1p, h1p, w2f)

    aff2 = _bn_affine(jnp.sum(st2, axis=0)[:2], cnt, g2, b2)     # (2, Cp)

    # ======== apply2: BN affine + PReLU + residual add + final PReLU ========
    def apply2_kernel(zc_ref, skip_ref, aff_ref, a_ref, y_ref):
        z = zc_ref[...].astype(jnp.float32)
        aff = aff_ref[...]
        z = z * aff[0] + aff[1]
        a2, a3 = a_ref[0, 0], a_ref[0, 1]
        h2 = jnp.where(z > 0, z, a2 * z)
        s = h2 + skip_ref[...].astype(jnp.float32)
        y_ref[...] = jnp.where(s > 0, s, a3 * s)

    row_spec2 = pl.BlockSpec((1, th2, Wo, Cp), lambda n, j: (n, j, 0, 0))
    alphas23 = jnp.stack([p["alpha2"][0], p["alpha3"][0]]).reshape(1, 2)

    y = pl.pallas_call(
        apply2_kernel,
        grid=(N, T2),
        in_specs=[row_spec2, row_spec2,
                  pl.BlockSpec((2, Cp), lambda n, j: (0, 0)), smem_spec],
        out_specs=row_spec2,
        out_shape=jax.ShapeDtypeStruct((N, Ho, Wo, Cp), jnp.float32),
        compiler_params=par2,
    )(z2, skip, aff2, alphas23)

    return jnp.transpose(y[..., :Cout], (0, 3, 1, 2))            # NCHW


def init_params(key, cin, cout):
    """Deterministic parameter init with PyTorch-like shapes/ranges."""
    ks = jax.random.split(key, 6)

    def conv_w(k, shape):
        fan_in = shape[1] * shape[2] * shape[3]
        b = 1.0 / (fan_in ** 0.5)
        return jax.random.uniform(k, shape, jnp.float32, -b, b)

    def conv_b(k, co, fan_in):
        b = 1.0 / (fan_in ** 0.5)
        return jax.random.uniform(k, (co,), jnp.float32, -b, b)

    p = {
        "w1": conv_w(ks[0], (cout, cin, 3, 3)),
        "b1": conv_b(ks[1], cout, cin * 9),
        "w2": conv_w(ks[2], (cout, cout, 3, 3)),
        "b2": conv_b(ks[3], cout, cout * 9),
        "wds": conv_w(ks[4], (cout, cin, 1, 1)),
        "bds": conv_b(ks[5], cout, cin),
    }
    for name in ("bn1", "bn2", "bnds"):
        p[name + "_gamma"] = jnp.ones((cout,), jnp.float32)
        p[name + "_beta"] = jnp.zeros((cout,), jnp.float32)
    # nn.PReLU() default: single parameter, init 0.25 (three fresh instances)
    p["alpha1"] = jnp.full((1,), 0.25, jnp.float32)
    p["alpha2"] = jnp.full((1,), 0.25, jnp.float32)
    p["alpha3"] = jnp.full((1,), 0.25, jnp.float32)
    return p


def _ref_forward(x_nchw, p):
    """Pure-JAX f32 reference (NCHW, lax conv) for a correctness check."""
    def conv(x, w, b, stride, pad):
        y = jax.lax.conv_general_dilated(
            x, w, (stride, stride), [(pad, pad), (pad, pad)],
            dimension_numbers=("NCHW", "OIHW", "NCHW"))
        return y + b[None, :, None, None]

    def bn(x, g, be):
        mu = jnp.mean(x, axis=(0, 2, 3), keepdims=True)
        var = jnp.mean((x - mu) ** 2, axis=(0, 2, 3), keepdims=True)
        return ((x - mu) / jnp.sqrt(var + _EPS)
                * g[None, :, None, None] + be[None, :, None, None])

    def prelu(x, a):
        return jnp.where(x > 0, x, a * x)

    skip = bn(conv(x_nchw, p["wds"], p["bds"], 2, 0),
              p["bnds_gamma"], p["bnds_beta"])
    h1 = prelu(bn(conv(x_nchw, p["w1"], p["b1"], 2, 1),
                  p["bn1_gamma"], p["bn1_beta"]), p["alpha1"][0])
    h2 = prelu(bn(conv(h1, p["w2"], p["b2"], 1, 1),
                  p["bn2_gamma"], p["bn2_beta"]), p["alpha2"][0])
    return prelu(h2 + skip, p["alpha3"][0])


if __name__ == "__main__":
    N, Cin, Cout, H, W = 2, 4, 8, 16, 16
    key = jax.random.PRNGKey(0)
    kx, kp = jax.random.split(key)
    x = jax.random.normal(kx, (N, Cin, H, W), jnp.float32)
    params = init_params(kp, Cin, Cout)

    fwd = jax.jit(conv_res_block, static_argnames=("tile_h1", "tile_h2"))
    # tile_h1 = tile_h2 = 4 -> 2 H-tiles per image: exercises the tiled BN
    # partials and the masked top/bottom halo rows of the conv2 tiling.
    out = jax.block_until_ready(fwd(x, params, tile_h1=4, tile_h2=4))

    assert out.shape == (N, Cout, H // 2, W // 2), out.shape
    ref = _ref_forward(x, params)
    # bf16 MXU operands and bf16 z/h1/skip caches loosen tolerance vs f32 ref.
    assert jnp.allclose(out, ref, rtol=1e-1, atol=1e-1), \
        float(jnp.max(jnp.abs(out - ref)))
    print("KERNEL_OK")
</pallas_src>

<mosaic_0001>
module attributes {stable_mosaic.version = 11 : i64} {
  func.func @stats1_kernel(%arg0: i32, %arg1: i32, %arg2: memref<32x128xbf16, #tpu.memory_space<vmem>>, %arg3: memref<128x256xbf16, #tpu.memory_space<vmem>>, %arg4: memref<32x256xbf16, #tpu.memory_space<vmem>>, %arg5: memref<1x8x256xf32, #tpu.memory_space<vmem>>) attributes {dimension_semantics = [#tpu.dimension_semantics<parallel>, #tpu.dimension_semantics<parallel>], iteration_bounds = array<i64: 2, 2>, scalar_prefetch = 0 : i64, scratch_operands = 0 : i64, tpu.core_type = #tpu.core_type<tc>, window_params = [{transform_indices = @transform_0, window_bounds = array<i64: 32, 128>}, {pipeline_mode = #tpu.pipeline_mode<synchronous>, transform_indices = @transform_1, window_bounds = array<i64: 128, 256>}, {transform_indices = @transform_2, window_bounds = array<i64: 32, 256>}, {transform_indices = @transform_3, window_bounds = array<i64: 1, 8, 256>}]} {
    %c0 = arith.constant 0 : index
    %c0_0 = arith.constant 0 : index
    %0 = vector.load %arg2[%c0, %c0_0] : memref<32x128xbf16, #tpu.memory_space<vmem>>, vector<32x128xbf16>
    %c0_1 = arith.constant 0 : index
    %c0_2 = arith.constant 0 : index
    %1 = vector.load %arg3[%c0_1, %c0_2] : memref<128x256xbf16, #tpu.memory_space<vmem>>, vector<128x256xbf16>
    %cst = arith.constant dense<0.000000e+00> : vector<32x256xf32>
    %2 = tpu.matmul %0, %1, %cst {dimension_numbers = #tpu.dot_dimension_numbers<[1], [0], [0], [1], [0, 0, 1, 1], [], []>} : vector<32x128xbf16>, vector<128x256xbf16>, vector<32x256xf32> -> vector<32x256xf32>
    %3 = arith.truncf %2 : vector<32x256xf32> to vector<32x256xbf16>
    %c0_3 = arith.constant 0 : index
    %c0_4 = arith.constant 0 : index
    %4 = vector.load %arg4[%c0_3, %c0_4] : memref<32x256xbf16, #tpu.memory_space<vmem>>, vector<32x256xbf16>
    tpu.vector_store %arg4[%c0_3, %c0_4], %3 {strides = array<i32>} : memref<32x256xbf16, #tpu.memory_space<vmem>>, vector<32x256xbf16>,
    %cst_5 = arith.constant dense<0.000000e+00> : vector<256xf32>
    %5 = vector.multi_reduction <add>, %2, %cst_5 [0] : vector<32x256xf32> to vector<256xf32>
    %6 = vector.shape_cast %5 : vector<256xf32> to vector<1x256xf32>
    %7 = arith.mulf %2, %2 : vector<32x256xf32>
    %cst_6 = arith.constant dense<0.000000e+00> : vector<256xf32>
    %8 = vector.multi_reduction <add>, %7, %cst_6 [0] : vector<32x256xf32> to vector<256xf32>
    %9 = vector.shape_cast %8 : vector<256xf32> to vector<1x256xf32>
    %cst_7 = arith.constant 0.000000e+00 : f32
    %10 = vector.broadcast %cst_7 : f32 to vector<6x256xf32>
    %11 = tpu.concatenate %6, %9, %10 in 0 : vector<1x256xf32>, vector<1x256xf32>, vector<6x256xf32> -> vector<8x256xf32>
    %12 = vector.shape_cast %11 : vector<8x256xf32> to vector<1x8x256xf32>
    %c0_8 = arith.constant 0 : index
    %c0_9 = arith.constant 0 : index
    %c0_10 = arith.constant 0 : index
    %13 = vector.load %arg5[%c0_8, %c0_9, %c0_10] : memref<1x8x256xf32, #tpu.memory_space<vmem>>, vector<1x8x256xf32>
    tpu.vector_store %arg5[%c0_8, %c0_9, %c0_10], %12 {strides = array<i32>} : memref<1x8x256xf32, #tpu.memory_space<vmem>>, vector<1x8x256xf32>,
    return
  }
  func.func @transform_0(%arg0: i32, %arg1: i32) -> (i32, i32) {
    %c2_i32 = arith.constant 2 : i32
    %0 = arith.muli %arg0, %c2_i32 : i32
    %1 = arith.addi %0, %arg1 : i32
    %c0_i32 = arith.constant 0 : i32
    %c0_i32_0 = arith.constant 0 : i32
    return %1, %c0_i32 : i32, i32
  }
  func.func @transform_1(%arg0: i32, %arg1: i32) -> (i32, i32) {
    %c0_i32 = arith.constant 0 : i32
    %c0_i32_0 = arith.constant 0 : i32
    %c0_i32_1 = arith.constant 0 : i32
    return %c0_i32, %c0_i32_0 : i32, i32
  }
  func.func @transform_2(%arg0: i32, %arg1: i32) -> (i32, i32) {
    %c2_i32 = arith.constant 2 : i32
    %0 = arith.muli %arg0, %c2_i32 : i32
    %1 = arith.addi %0, %arg1 : i32
    %c0_i32 = arith.constant 0 : i32
    %c0_i32_0 = arith.constant 0 : i32
    return %1, %c0_i32 : i32, i32
  }
  func.func @transform_3(%arg0: i32, %arg1: i32) -> (i32, i32, i32) {
    %c2_i32 = arith.constant 2 : i32
    %0 = arith.muli %arg0, %c2_i32 : i32
    %1 = arith.addi %0, %arg1 : i32
    %c0_i32 = arith.constant 0 : i32
    %c0_i32_0 = arith.constant 0 : i32
    %c0_i32_1 = arith.constant 0 : i32
    return %1, %c0_i32, %c0_i32_0 : i32, i32, i32
  }
}

module attributes {stable_mosaic.version = 11 : i64} {
  func.func @apply1_kernel(%arg0: i32, %arg1: i32, %arg2: memref<1x4x8x256xbf16, #tpu.memory_space<vmem>>, %arg3: memref<2x256xf32, #tpu.memory_space<vmem>>, %arg4: memref<1x1xf32, #tpu.memory_space<smem>>, %arg5: memref<1x4x10x128xbf16, #tpu.memory_space<vmem>>, %arg6: memref<1x4x8x128xbf16, #tpu.memory_space<vmem>>) attributes {dimension_semantics = [#tpu.dimension_semantics<parallel>, #tpu.dimension_semantics<parallel>], iteration_bounds = array<i64: 2, 2>, scalar_prefetch = 0 : i64, scratch_operands = 0 : i64, tpu.core_type = #tpu.core_type<tc>, window_params = [{transform_indices = @transform_0, window_bounds = array<i64: 1, 4, 8, 256>}, {pipeline_mode = #tpu.pipeline_mode<synchronous>, transform_indices = @transform_1, window_bounds = array<i64: 2, 256>}, {transform_indices = @transform_2, window_bounds = array<i64: 1, 1>}, {transform_indices = @transform_3, window_bounds = array<i64: 1, 4, 10, 128>}, {transform_indices = @transform_4, window_bounds = array<i64: 1, 4, 8, 128>}]} {
    %c0 = arith.constant 0 : index
    %c0_0 = arith.constant 0 : index
    %c0_1 = arith.constant 0 : index
    %c0_2 = arith.constant 0 : index
    %0 = vector.load %arg2[%c0, %c0_0, %c0_1, %c0_2] : memref<1x4x8x256xbf16, #tpu.memory_space<vmem>>, vector<1x4x8x256xbf16>
    %1 = arith.extf %0 : vector<1x4x8x256xbf16> to vector<1x4x8x256xf32>
    %c0_3 = arith.constant 0 : index
    %c0_4 = arith.constant 0 : index
    %2 = vector.load %arg3[%c0_3, %c0_4] : memref<2x256xf32, #tpu.memory_space<vmem>>, vector<2x256xf32>
    %3 = vector.extract_strided_slice %2 {offsets = [0, 0], sizes = [1, 256], strides = [1, 1]} : vector<2x256xf32> to vector<1x256xf32>
    %4 = vector.shape_cast %3 : vector<1x256xf32> to vector<256xf32>
    %5 = vector.shape_cast %4 : vector<256xf32> to vector<1x1x1x256xf32>
    %6 = vector.broadcast %5 : vector<1x1x1x256xf32> to vector<1x4x8x256xf32>
    %7 = arith.mulf %1, %6 : vector<1x4x8x256xf32>
    %8 = vector.extract_strided_slice %2 {offsets = [1, 0], sizes = [1, 256], strides = [1, 1]} : vector<2x256xf32> to vector<1x256xf32>
    %9 = vector.shape_cast %8 : vector<1x256xf32> to vector<256xf32>
    %10 = vector.shape_cast %9 : vector<256xf32> to vector<1x1x1x256xf32>
    %11 = vector.broadcast %10 : vector<1x1x1x256xf32> to vector<1x4x8x256xf32>
    %12 = arith.addf %7, %11 : vector<1x4x8x256xf32>
    %13 = vector.extract_strided_slice %12 {offsets = [0, 0, 0, 0], sizes = [1, 4, 8, 128], strides = [1, 1, 1, 1]} : vector<1x4x8x256xf32> to vector<1x4x8x128xf32>
    %14 = vector.extract_strided_slice %12 {offsets = [0, 0, 0, 128], sizes = [1, 4, 8, 128], strides = [1, 1, 1, 1]} : vector<1x4x8x256xf32> to vector<1x4x8x128xf32>
    %c0_5 = arith.constant 0 : index
    %c0_6 = arith.constant 0 : index
    %15 = memref.load %arg4[%c0_5, %c0_6] : memref<1x1xf32, #tpu.memory_space<smem>>
    %cst = arith.constant 0.000000e+00 : f32
    %16 = vector.broadcast %cst : f32 to vector<1x4x8x128xf32>
    %17 = arith.cmpf ogt, %13, %16 : vector<1x4x8x128xf32>
    %18 = vector.broadcast %15 : f32 to vector<1x4x8x128xf32>
    %19 = arith.mulf %18, %13 : vector<1x4x8x128xf32>
    %20 = arith.select %17, %13, %19 : vector<1x4x8x128xi1>, vector<1x4x8x128xf32>
    %cst_7 = arith.constant 0.000000e+00 : f32
    %21 = vector.broadcast %cst_7 : f32 to vector<1x4x1x128xf32>
    %22 = tpu.concatenate %21, %20, %21 in 2 : vector<1x4x1x128xf32>, vector<1x4x8x128xf32>, vector<1x4x1x128xf32> -> vector<1x4x10x128xf32>
    %23 = arith.truncf %22 : vector<1x4x10x128xf32> to vector<1x4x10x128xbf16>
    %c0_8 = arith.constant 0 : index
    %c0_9 = arith.constant 0 : index
    %c0_10 = arith.constant 0 : index
    %c0_11 = arith.constant 0 : index
    %24 = vector.load %arg5[%c0_8, %c0_9, %c0_10, %c0_11] : memref<1x4x10x128xbf16, #tpu.memory_space<vmem>>, vector<1x4x10x128xbf16>
    tpu.vector_store %arg5[%c0_8, %c0_9, %c0_10, %c0_11], %23 {strides = array<i32>} : memref<1x4x10x128xbf16, #tpu.memory_space<vmem>>, vector<1x4x10x128xbf16>,
    %25 = arith.truncf %14 : vector<1x4x8x128xf32> to vector<1x4x8x128xbf16>
    %c0_12 = arith.constant 0 : index
    %c0_13 = arith.constant 0 : index
    %c0_14 = arith.constant 0 : index
    %c0_15 = arith.constant 0 : index
    %26 = vector.load %arg6[%c0_12, %c0_13, %c0_14, %c0_15] : memref<1x4x8x128xbf16, #tpu.memory_space<vmem>>, vector<1x4x8x128xbf16>
    tpu.vector_store %arg6[%c0_12, %c0_13, %c0_14, %c0_15], %25 {strides = array<i32>} : memref<1x4x8x128xbf16, #tpu.memory_space<vmem>>, vector<1x4x8x128xbf16>,
    return
  }
  func.func @transform_0(%arg0: i32, %arg1: i32) -> (i32, i32, i32, i32) {
    %c0_i32 = arith.constant 0 : i32
    %c0_i32_0 = arith.constant 0 : i32
    %c0_i32_1 = arith.constant 0 : i32
    return %arg0, %arg1, %c0_i32, %c0_i32_0 : i32, i32, i32, i32
  }
  func.func @transform_1(%arg0: i32, %arg1: i32) -> (i32, i32) {
    %c0_i32 = arith.constant 0 : i32
    %c0_i32_0 = arith.constant 0 : i32
    %c0_i32_1 = arith.constant 0 : i32
    return %c0_i32, %c0_i32_0 : i32, i32
  }
  func.func @transform_2(%arg0: i32, %arg1: i32) -> (i32, i32) {
    %c0_i32 = arith.constant 0 : i32
    %c0_i32_0 = arith.constant 0 : i32
    %c0_i32_1 = arith.constant 0 : i32
    return %c0_i32, %c0_i32_0 : i32, i32
  }
  func.func @transform_3(%arg0: i32, %arg1: i32) -> (i32, i32, i32, i32) {
    %c0_i32 = arith.constant 0 : i32
    %c0_i32_0 = arith.constant 0 : i32
    %c0_i32_1 = arith.constant 0 : i32
    return %arg0, %arg1, %c0_i32, %c0_i32_0 : i32, i32, i32, i32
  }
  func.func @transform_4(%arg0: i32, %arg1: i32) -> (i32, i32, i32, i32) {
    %c0_i32 = arith.constant 0 : i32
    %c0_i32_0 = arith.constant 0 : i32
    %c0_i32_1 = arith.constant 0 : i32
    return %arg0, %arg1, %c0_i32, %c0_i32_0 : i32, i32, i32, i32
  }
}

module attributes {stable_mosaic.version = 11 : i64} {
  func.func @stats2_kernel(%arg0: i32, %arg1: i32, %arg2: memref<1x4x10x128xbf16, #tpu.memory_space<vmem>>, %arg3: memref<1x1x10x128xbf16, #tpu.memory_space<vmem>>, %arg4: memref<1x1x10x128xbf16, #tpu.memory_space<vmem>>, %arg5: memref<1152x128xbf16, #tpu.memory_space<vmem>>, %arg6: memref<1x4x8x128xbf16, #tpu.memory_space<vmem>>, %arg7: memref<1x8x128xf32, #tpu.memory_space<vmem>>) attributes {dimension_semantics = [#tpu.dimension_semantics<parallel>, #tpu.dimension_semantics<parallel>], iteration_bounds = array<i64: 2, 2>, scalar_prefetch = 0 : i64, scratch_operands = 0 : i64, tpu.core_type = #tpu.core_type<tc>, window_params = [{transform_indices = @transform_0, window_bounds = array<i64: 1, 4, 10, 128>}, {transform_indices = @transform_1, window_bounds = array<i64: 1, 1, 10, 128>}, {transform_indices = @transform_2, window_bounds = array<i64: 1, 1, 10, 128>}, {pipeline_mode = #tpu.pipeline_mode<synchronous>, transform_indices = @transform_3, window_bounds = array<i64: 1152, 128>}, {transform_indices = @transform_4, window_bounds = array<i64: 1, 4, 8, 128>}, {transform_indices = @transform_5, window_bounds = array<i64: 1, 8, 128>}]} {
    %c0_i32 = arith.constant 0 : i32
    %0 = arith.cmpi sgt, %arg1, %c0_i32 : i32
    %1 = arith.extui %0 : i1 to i32
    %2 = arith.sitofp %1 : i32 to f32
    %c1_i32 = arith.constant 1 : i32
    %3 = arith.cmpi slt, %arg1, %c1_i32 : i32
    %4 = arith.extui %3 : i1 to i32
    %5 = arith.sitofp %4 : i32 to f32
    %c0 = arith.constant 0 : index
    %c0_0 = arith.constant 0 : index
    %c0_1 = arith.constant 0 : index
    %c0_2 = arith.constant 0 : index
    %6 = vector.load %arg3[%c0, %c0_0, %c0_1, %c0_2] : memref<1x1x10x128xbf16, #tpu.memory_space<vmem>>, vector<1x1x10x128xbf16>
    %7 = vector.shape_cast %6 : vector<1x1x10x128xbf16> to vector<1x10x128xbf16>
    %8 = arith.extf %7 : vector<1x10x128xbf16> to vector<1x10x128xf32>
    %9 = vector.broadcast %2 : f32 to vector<1x10x128xf32>
    %10 = arith.mulf %8, %9 : vector<1x10x128xf32>
    %c0_3 = arith.constant 0 : index
    %c0_4 = arith.constant 0 : index
    %c0_5 = arith.constant 0 : index
    %c0_6 = arith.constant 0 : index
    %11 = vector.load %arg4[%c0_3, %c0_4, %c0_5, %c0_6] : memref<1x1x10x128xbf16, #tpu.memory_space<vmem>>, vector<1x1x10x128xbf16>
    %12 = vector.shape_cast %11 : vector<1x1x10x128xbf16> to vector<1x10x128xbf16>
    %13 = arith.extf %12 : vector<1x10x128xbf16> to vector<1x10x128xf32>
    %14 = vector.broadcast %5 : f32 to vector<1x10x128xf32>
    %15 = arith.mulf %13, %14 : vector<1x10x128xf32>
    %c0_7 = arith.constant 0 : index
    %c0_8 = arith.constant 0 : index
    %c0_9 = arith.constant 0 : index
    %c0_10 = arith.constant 0 : index
    %16 = vector.load %arg2[%c0_7, %c0_8, %c0_9, %c0_10] : memref<1x4x10x128xbf16, #tpu.memory_space<vmem>>, vector<1x4x10x128xbf16>
    %17 = vector.shape_cast %16 : vector<1x4x10x128xbf16> to vector<4x10x128xbf16>
    %18 = arith.extf %17 : vector<4x10x128xbf16> to vector<4x10x128xf32>
    %19 = tpu.concatenate %10, %18, %15 in 0 : vector<1x10x128xf32>, vector<4x10x128xf32>, vector<1x10x128xf32> -> vector<6x10x128xf32>
    %20 = vector.extract_strided_slice %19 {offsets = [0, 0, 0], sizes = [4, 8, 128], strides = [1, 1, 1]} : vector<6x10x128xf32> to vector<4x8x128xf32>
    %21 = vector.shape_cast %20 : vector<4x8x128xf32> to vector<32x128xf32>
    %22 = vector.extract_strided_slice %19 {offsets = [0, 1, 0], sizes = [4, 8, 128], strides = [1, 1, 1]} : vector<6x10x128xf32> to vector<4x8x128xf32>
    %23 = vector.shape_cast %22 : vector<4x8x128xf32> to vector<32x128xf32>
    %24 = vector.extract_strided_slice %19 {offsets = [0, 2, 0], sizes = [4, 8, 128], strides = [1, 1, 1]} : vector<6x10x128xf32> to vector<4x8x128xf32>
    %25 = vector.shape_cast %24 : vector<4x8x128xf32> to vector<32x128xf32>
    %26 = vector.extract_strided_slice %19 {offsets = [1, 0, 0], sizes = [4, 8, 128], strides = [1, 1, 1]} : vector<6x10x128xf32> to vector<4x8x128xf32>
    %27 = vector.shape_cast %26 : vector<4x8x128xf32> to vector<32x128xf32>
    %28 = vector.extract_strided_slice %19 {offsets = [1, 1, 0], sizes = [4, 8, 128], strides = [1, 1, 1]} : vector<6x10x128xf32> to vector<4x8x128xf32>
    %29 = vector.shape_cast %28 : vector<4x8x128xf32> to vector<32x128xf32>
    %30 = vector.extract_strided_slice %19 {offsets = [1, 2, 0], sizes = [4, 8, 128], strides = [1, 1, 1]} : vector<6x10x128xf32> to vector<4x8x128xf32>
    %31 = vector.shape_cast %30 : vector<4x8x128xf32> to vector<32x128xf32>
    %32 = vector.extract_strided_slice %19 {offsets = [2, 0, 0], sizes = [4, 8, 128], strides = [1, 1, 1]} : vector<6x10x128xf32> to vector<4x8x128xf32>
    %33 = vector.shape_cast %32 : vector<4x8x128xf32> to vector<32x128xf32>
    %34 = vector.extract_strided_slice %19 {offsets = [2, 1, 0], sizes = [4, 8, 128], strides = [1, 1, 1]} : vector<6x10x128xf32> to vector<4x8x128xf32>
    %35 = vector.shape_cast %34 : vector<4x8x128xf32> to vector<32x128xf32>
    %36 = vector.extract_strided_slice %19 {offsets = [2, 2, 0], sizes = [4, 8, 128], strides = [1, 1, 1]} : vector<6x10x128xf32> to vector<4x8x128xf32>
    %37 = vector.shape_cast %36 : vector<4x8x128xf32> to vector<32x128xf32>
    %38 = tpu.concatenate %21, %23, %25, %27, %29, %31, %33, %35, %37 in 1 : vector<32x128xf32>, vector<32x128xf32>, vector<32x128xf32>, vector<32x128xf32>, vector<32x128xf32>, vector<32x128xf32>, vector<32x128xf32>, vector<32x128xf32>, vector<32x128xf32> -> vector<32x1152xf32>
    %39 = arith.truncf %38 : vector<32x1152xf32> to vector<32x1152xbf16>
    %c0_11 = arith.constant 0 : index
    %c0_12 = arith.constant 0 : index
    %40 = vector.load %arg5[%c0_11, %c0_12] : memref<1152x128xbf16, #tpu.memory_space<vmem>>, vector<1152x128xbf16>
    %cst = arith.constant dense<0.000000e+00> : vector<32x128xf32>
    %41 = tpu.matmul %39, %40, %cst {dimension_numbers = #tpu.dot_dimension_numbers<[1], [0], [0], [1], [0, 0, 1, 1], [], []>} : vector<32x1152xbf16>, vector<1152x128xbf16>, vector<32x128xf32> -> vector<32x128xf32>
    %42 = vector.shape_cast %41 : vector<32x128xf32> to vector<1x4x8x128xf32>
    %43 = arith.truncf %42 : vector<1x4x8x128xf32> to vector<1x4x8x128xbf16>
    %c0_13 = arith.constant 0 : index
    %c0_14 = arith.constant 0 : index
    %c0_15 = arith.constant 0 : index
    %c0_16 = arith.constant 0 : index
    %44 = vector.load %arg6[%c0_13, %c0_14, %c0_15, %c0_16] : memref<1x4x8x128xbf16, #tpu.memory_space<vmem>>, vector<1x4x8x128xbf16>
    tpu.vector_store %arg6[%c0_13, %c0_14, %c0_15, %c0_16], %43 {strides = array<i32>} : memref<1x4x8x128xbf16, #tpu.memory_space<vmem>>, vector<1x4x8x128xbf16>,
    %cst_17 = arith.constant dense<0.000000e+00> : vector<128xf32>
    %45 = vector.multi_reduction <add>, %41, %cst_17 [0] : vector<32x128xf32> to vector<128xf32>
    %46 = vector.shape_cast %45 : vector<128xf32> to vector<1x128xf32>
    %47 = arith.mulf %41, %41 : vector<32x128xf32>
    %cst_18 = arith.constant dense<0.000000e+00> : vector<128xf32>
    %48 = vector.multi_reduction <add>, %47, %cst_18 [0] : vector<32x128xf32> to vector<128xf32>
    %49 = vector.shape_cast %48 : vector<128xf32> to vector<1x128xf32>
    %cst_19 = arith.constant 0.000000e+00 : f32
    %50 = vector.broadcast %cst_19 : f32 to vector<6x128xf32>
    %51 = tpu.concatenate %46, %49, %50 in 0 : vector<1x128xf32>, vector<1x128xf32>, vector<6x128xf32> -> vector<8x128xf32>
    %52 = vector.shape_cast %51 : vector<8x128xf32> to vector<1x8x128xf32>
    %c0_20 = arith.constant 0 : index
    %c0_21 = arith.constant 0 : index
    %c0_22 = arith.constant 0 : index
    %53 = vector.load %arg7[%c0_20, %c0_21, %c0_22] : memref<1x8x128xf32, #tpu.memory_space<vmem>>, vector<1x8x128xf32>
    tpu.vector_store %arg7[%c0_20, %c0_21, %c0_22], %52 {strides = array<i32>} : memref<1x8x128xf32, #tpu.memory_space<vmem>>, vector<1x8x128xf32>,
    return
  }
  func.func @transform_0(%arg0: i32, %arg1: i32) -> (i32, i32, i32, i32) {
    %c0_i32 = arith.constant 0 : i32
    %c0_i32_0 = arith.constant 0 : i32
    %c0_i32_1 = arith.constant 0 : i32
    return %arg0, %arg1, %c0_i32, %c0_i32_0 : i32, i32, i32, i32
  }
  func.func @transform_1(%arg0: i32, %arg1: i32) -> (i32, i32, i32, i32) {
    %c4_i32 = arith.constant 4 : i32
    %0 = arith.muli %arg1, %c4_i32 : i32
    %c1_i32 = arith.constant 1 : i32
    %1 = arith.subi %0, %c1_i32 : i32
    %c0_i32 = arith.constant 0 : i32
    %2 = arith.maxsi %1, %c0_i32 : i32
    %c0_i32_0 = arith.constant 0 : i32
    %c0_i32_1 = arith.constant 0 : i32
    %c0_i32_2 = arith.constant 0 : i32
    return %arg0, %2, %c0_i32_0, %c0_i32_1 : i32, i32, i32, i32
  }
  func.func @transform_2(%arg0: i32, %arg1: i32) -> (i32, i32, i32, i32) {
    %c1_i32 = arith.constant 1 : i32
    %0 = arith.addi %arg1, %c1_i32 : i32
    %c4_i32 = arith.constant 4 : i32
    %1 = arith.muli %0, %c4_i32 : i32
    %c7_i32 = arith.constant 7 : i32
    %2 = arith.minsi %1, %c7_i32 : i32
    %c0_i32 = arith.constant 0 : i32
    %c0_i32_0 = arith.constant 0 : i32
    %c0_i32_1 = arith.constant 0 : i32
    return %arg0, %2, %c0_i32, %c0_i32_0 : i32, i32, i32, i32
  }
  func.func @transform_3(%arg0: i32, %arg1: i32) -> (i32, i32) {
    %c0_i32 = arith.constant 0 : i32
    %c0_i32_0 = arith.constant 0 : i32
    %c0_i32_1 = arith.constant 0 : i32
    return %c0_i32, %c0_i32_0 : i32, i32
  }
  func.func @transform_4(%arg0: i32, %arg1: i32) -> (i32, i32, i32, i32) {
    %c0_i32 = arith.constant 0 : i32
    %c0_i32_0 = arith.constant 0 : i32
    %c0_i32_1 = arith.constant 0 : i32
    return %arg0, %arg1, %c0_i32, %c0_i32_0 : i32, i32, i32, i32
  }
  func.func @transform_5(%arg0: i32, %arg1: i32) -> (i32, i32, i32) {
    %c2_i32 = arith.constant 2 : i32
    %0 = arith.muli %arg0, %c2_i32 : i32
    %1 = arith.addi %0, %arg1 : i32
    %c0_i32 = arith.constant 0 : i32
    %c0_i32_0 = arith.constant 0 : i32
    %c0_i32_1 = arith.constant 0 : i32
    return %1, %c0_i32, %c0_i32_0 : i32, i32, i32
  }
}

module attributes {stable_mosaic.version = 11 : i64} {
  func.func @apply2_kernel(%arg0: i32, %arg1: i32, %arg2: memref<1x4x8x128xbf16, #tpu.memory_space<vmem>>, %arg3: memref<1x4x8x128xbf16, #tpu.memory_space<vmem>>, %arg4: memref<2x128xf32, #tpu.memory_space<vmem>>, %arg5: memref<1x2xf32, #tpu.memory_space<smem>>, %arg6: memref<1x4x8x128xf32, #tpu.memory_space<vmem>>) attributes {dimension_semantics = [#tpu.dimension_semantics<parallel>, #tpu.dimension_semantics<parallel>], iteration_bounds = array<i64: 2, 2>, scalar_prefetch = 0 : i64, scratch_operands = 0 : i64, tpu.core_type = #tpu.core_type<tc>, window_params = [{transform_indices = @transform_0, window_bounds = array<i64: 1, 4, 8, 128>}, {transform_indices = @transform_1, window_bounds = array<i64: 1, 4, 8, 128>}, {pipeline_mode = #tpu.pipeline_mode<synchronous>, transform_indices = @transform_2, window_bounds = array<i64: 2, 128>}, {transform_indices = @transform_3, window_bounds = array<i64: 1, 2>}, {transform_indices = @transform_4, window_bounds = array<i64: 1, 4, 8, 128>}]} {
    %c0 = arith.constant 0 : index
    %c0_0 = arith.constant 0 : index
    %c0_1 = arith.constant 0 : index
    %c0_2 = arith.constant 0 : index
    %0 = vector.load %arg2[%c0, %c0_0, %c0_1, %c0_2] : memref<1x4x8x128xbf16, #tpu.memory_space<vmem>>, vector<1x4x8x128xbf16>
    %1 = arith.extf %0 : vector<1x4x8x128xbf16> to vector<1x4x8x128xf32>
    %c0_3 = arith.constant 0 : index
    %c0_4 = arith.constant 0 : index
    %2 = vector.load %arg4[%c0_3, %c0_4] : memref<2x128xf32, #tpu.memory_space<vmem>>, vector<2x128xf32>
    %3 = vector.extract_strided_slice %2 {offsets = [0, 0], sizes = [1, 128], strides = [1, 1]} : vector<2x128xf32> to vector<1x128xf32>
    %4 = vector.shape_cast %3 : vector<1x128xf32> to vector<128xf32>
    %5 = vector.shape_cast %4 : vector<128xf32> to vector<1x1x1x128xf32>
    %6 = vector.broadcast %5 : vector<1x1x1x128xf32> to vector<1x4x8x128xf32>
    %7 = arith.mulf %1, %6 : vector<1x4x8x128xf32>
    %8 = vector.extract_strided_slice %2 {offsets = [1, 0], sizes = [1, 128], strides = [1, 1]} : vector<2x128xf32> to vector<1x128xf32>
    %9 = vector.shape_cast %8 : vector<1x128xf32> to vector<128xf32>
    %10 = vector.shape_cast %9 : vector<128xf32> to vector<1x1x1x128xf32>
    %11 = vector.broadcast %10 : vector<1x1x1x128xf32> to vector<1x4x8x128xf32>
    %12 = arith.addf %7, %11 : vector<1x4x8x128xf32>
    %c0_5 = arith.constant 0 : index
    %c0_6 = arith.constant 0 : index
    %13 = memref.load %arg5[%c0_5, %c0_6] : memref<1x2xf32, #tpu.memory_space<smem>>
    %c0_7 = arith.constant 0 : index
    %c1 = arith.constant 1 : index
    %14 = memref.load %arg5[%c0_7, %c1] : memref<1x2xf32, #tpu.memory_space<smem>>
    %cst = arith.constant 0.000000e+00 : f32
    %15 = vector.broadcast %cst : f32 to vector<1x4x8x128xf32>
    %16 = arith.cmpf ogt, %12, %15 : vector<1x4x8x128xf32>
    %17 = vector.broadcast %13 : f32 to vector<1x4x8x128xf32>
    %18 = arith.mulf %17, %12 : vector<1x4x8x128xf32>
    %19 = arith.select %16, %12, %18 : vector<1x4x8x128xi1>, vector<1x4x8x128xf32>
    %c0_8 = arith.constant 0 : index
    %c0_9 = arith.constant 0 : index
    %c0_10 = arith.constant 0 : index
    %c0_11 = arith.constant 0 : index
    %20 = vector.load %arg3[%c0_8, %c0_9, %c0_10, %c0_11] : memref<1x4x8x128xbf16, #tpu.memory_space<vmem>>, vector<1x4x8x128xbf16>
    %21 = arith.extf %20 : vector<1x4x8x128xbf16> to vector<1x4x8x128xf32>
    %22 = arith.addf %19, %21 : vector<1x4x8x128xf32>
    %cst_12 = arith.constant 0.000000e+00 : f32
    %23 = vector.broadcast %cst_12 : f32 to vector<1x4x8x128xf32>
    %24 = arith.cmpf ogt, %22, %23 : vector<1x4x8x128xf32>
    %25 = vector.broadcast %14 : f32 to vector<1x4x8x128xf32>
    %26 = arith.mulf %25, %22 : vector<1x4x8x128xf32>
    %27 = arith.select %24, %22, %26 : vector<1x4x8x128xi1>, vector<1x4x8x128xf32>
    %c0_13 = arith.constant 0 : index
    %c0_14 = arith.constant 0 : index
    %c0_15 = arith.constant 0 : index
    %c0_16 = arith.constant 0 : index
    %28 = vector.load %arg6[%c0_13, %c0_14, %c0_15, %c0_16] : memref<1x4x8x128xf32, #tpu.memory_space<vmem>>, vector<1x4x8x128xf32>
    tpu.vector_store %arg6[%c0_13, %c0_14, %c0_15, %c0_16], %27 {strides = array<i32>} : memref<1x4x8x128xf32, #tpu.memory_space<vmem>>, vector<1x4x8x128xf32>,
    return
  }
  func.func @transform_0(%arg0: i32, %arg1: i32) -> (i32, i32, i32, i32) {
    %c0_i32 = arith.constant 0 : i32
    %c0_i32_0 = arith.constant 0 : i32
    %c0_i32_1 = arith.constant 0 : i32
    return %arg0, %arg1, %c0_i32, %c0_i32_0 : i32, i32, i32, i32
  }
  func.func @transform_1(%arg0: i32, %arg1: i32) -> (i32, i32, i32, i32) {
    %c0_i32 = arith.constant 0 : i32
    %c0_i32_0 = arith.constant 0 : i32
    %c0_i32_1 = arith.constant 0 : i32
    return %arg0, %arg1, %c0_i32, %c0_i32_0 : i32, i32, i32, i32
  }
  func.func @transform_2(%arg0: i32, %arg1: i32) -> (i32, i32) {
    %c0_i32 = arith.constant 0 : i32
    %c0_i32_0 = arith.constant 0 : i32
    %c0_i32_1 = arith.constant 0 : i32
    return %c0_i32, %c0_i32_0 : i32, i32
  }
  func.func @transform_3(%arg0: i32, %arg1: i32) -> (i32, i32) {
    %c0_i32 = arith.constant 0 : i32
    %c0_i32_0 = arith.constant 0 : i32
    %c0_i32_1 = arith.constant 0 : i32
    return %c0_i32, %c0_i32_0 : i32, i32
  }
  func.func @transform_4(%arg0: i32, %arg1: i32) -> (i32, i32, i32, i32) {
    %c0_i32 = arith.constant 0 : i32
    %c0_i32_0 = arith.constant 0 : i32
    %c0_i32_1 = arith.constant 0 : i32
    return %arg0, %arg1, %c0_i32, %c0_i32_0 : i32, i32, i32, i32
  }
}

</mosaic_0001>

<bundles_post_ra>
// kernel: conv_res_block.4
= control target key start
LH: loop header
LB: loop body
LE: loop exit
PB: predicated region body
PF: predicated region fallthrough
CT: control target
= control target key end

     0   :  { %s791_s12 = smov 0   ;;  %s793_s13 = smov 0   ;;  %s906_s0 = inlined_call_operand.vmem [shape: bf16[128,128], index: 0, kind: input, shape index: {}]   ;;  %s907_s1 = inlined_call_operand.vmem [shape: bf16[128,256], index: 1, kind: input, shape index: {}]   ;;  %s908_s2 = inlined_call_operand.vmem [shape: bf16[128,256], index: 2, kind: output, shape index: {0}]   ;;  %s909_s3 = inlined_call_operand.vmem [shape: f32[4,8,256], index: 3, kind: output, shape index: {1}]  }
   0x1   :  { %s795_s14 = smov 0   ;;  %s797_s15 = smov 0  }
   0x2   :  { %s799_s16 = smov 0  }
   0x3 LB: > { %s23_s17 = sadd.s32 1, %s760_s14  ;;  %s26_s18 = sadd.s32 1, %s764_s15  ;;  %s768_s16 = sphi %s799_s16, %s14_s16   ;;  %s764_s15 = sphi %s797_s15, %s913_s15   ;;  %s760_s14 = sphi %s795_s14, %s912_s14   ;;  %s756_s13 = sphi %s793_s13, %s911_s13   ;;  %s752_s12 = sphi %s791_s12, %s910_s12  }
   0x4   : > { %p24_p0 = scmp.ge.s32.totalorder %s23_s17, 2  ;;  %p606_p1 = scmp.ge.s32.totalorder %s768_s16, 1 }
   0x5   : > { %p169_p2 = scmp.lt.s32.totalorder %s768_s16, 5 }
   0x6   : > { %s915_s17 = smov (%p24_p0, %s23_s17), 0  ;;  %s917_s18 = smov (!%p24_p0, %s26_s18), %s764_s15 }
   0x7   : > { %p170_p3 = pnand %p606_p1, %p169_p2  ;;  %p28_p4 = scmp.ge.s32.totalorder %s917_s18, 2 }
   0x8   : > { %s607_s21 = sshll.u32 (!%p170_p3), %s756_s13, 1 }
   0x9   : > { %s919_s18 = smov (%p28_p4, %s917_s18), 0  ;;  %173 = sbr.rel (%p170_p3) target bundleno = 271 (0x10f), region = 28 }
   0xa   : > { %s827_s24 = sadd.s32 (!%p170_p3), %s752_s12, %s607_s21 }
   0xb   : > { %s608_s27 = sshll.u32 (!%p170_p3), %s827_s24, 2  ;;  %p228_p6 = scmp.lt.s32.totalorder (!%p170_p3), %s827_s24, 3 }
   0xc   : > { %p208_p5 = scmp.lt.s32.totalorder (!%p170_p3), %s608_s27, 15 }
   0xe   : > { %v704_v0 = vld [vmem:[%s907_s1 + $0x74] ss:$8 sps:$4 sm:$0xff]   ;;  %v706_v1 = vld [vmem:[%s907_s1 + $0x70] ss:$8 sps:$4 sm:$0xff]   ;;  %v770_v2 = vmov 0   ;;  %s921_s27 = smov (!%p208_p5, %s608_s27), 15 }
   0xf   : > { %380 = vmatprep.mubr.bf16.mxu0 %v770_v2  ;;  %390 = vmatprep.mubr.bf16.mxu1 %v770_v2  ;;  %v707_v3 = vld [vmem:[%s907_s1 + $0x64] ss:$8 sps:$4 sm:$0xff]   ;;  %v709_v4 = vld [vmem:[%s907_s1 + $0x60] ss:$8 sps:$4 sm:$0xff]   ;;  %v710_v5 = vld [vmem:[%s907_s1 + $0x54] ss:$8 sps:$4 sm:$0xff]  }
  0x10   : > { %348 = vmatprep.subr.bf16.mxu0 %v704_v0  ;;  %647 = vmatprep.subr.bf16.mxu1 %v704_v0  ;;  %v712_v6 = vld [vmem:[%s907_s1 + $0x50] ss:$8 sps:$4 sm:$0xff]   ;;  %s609_s7 = sshll.u32 %s921_s27, 2  ;;  %v713_v7 = vld [vmem:[%s907_s1 + $0x44] ss:$8 sps:$4 sm:$0xff]   ;;  %s641_s11 = sshll.u32 %s921_s27, 3 }
  0x11   : > { %349 = vmatpush1.bf16.msra.mxu0 %v706_v1  ;;  %655 = vmatpush1.bf16.msra.mxu1 %v706_v1  ;;  %s851_s12 = scalar_lea.vmem %s906_s0, %s609_s7  ;;  %v715_v8 = vld [vmem:[%s907_s1 + $0x40] ss:$8 sps:$4 sm:$0xff]   ;;  %v716_v9 = vld [vmem:[%s907_s1 + $0x34] ss:$8 sps:$4 sm:$0xff]   ;;  %v718_v10 = vld [vmem:[%s907_s1 + $0x30] ss:$8 sps:$4 sm:$0xff]   ;;  %s222_s20 = scalar_lea.vmem %s908_s2, %s641_s11 }
  0x12   : > { %350 = vmatprep.subr.bf16.mxu0 %v707_v3  ;;  %648 = vmatprep.subr.bf16.mxu1 %v707_v3  ;;  %v719_v11 = vld [vmem:[%s907_s1 + $0x24] ss:$8 sps:$4 sm:$0xff]   ;;  %v721_v12 = vld [vmem:[%s907_s1 + $0x20] ss:$8 sps:$4 sm:$0xff]   ;;  %v722_v13 = vld [vmem:[%s907_s1 + $0x14] ss:$8 sps:$4 sm:$0xff]  }
  0x13   : > { %v724_v14 = vld [vmem:[%s907_s1 + $0x10] ss:$8 sps:$4 sm:$0xff]   ;;  %v725_v15 = vld [vmem:[%s907_s1 + $0x4] ss:$8 sps:$4 sm:$0xff]   ;;  %v727_v16 = vld [vmem:[%s907_s1] ss:$8 sps:$4 sm:$0xff]  }
  0x14   : > { %v728_v17 = vld [vmem:[%s851_s12] sm:$0xff]   ;;  %v729_v18 = vld [vmem:[%s851_s12 + $0x8] sm:$0xff]   ;;  %s923_s24 = smov (!%p228_p6, %s827_s24), 3  ;;  %vm473_vm0 = vcmask 1040384   ;;  %vm476_vm1 = vcmask 1041408  }
  0x15   : > { %351 = vmatpush1.bf16.msra.mxu0 %v709_v4  ;;  %656 = vmatpush1.bf16.msra.mxu1 %v709_v4  ;;  %s642_s27 = sshll.u32 %s923_s24, 4 }
  0x16   : > { %352 = vmatprep.subr.bf16.mxu0 %v710_v5  ;;  %649 = vmatprep.subr.bf16.mxu1 %v710_v5  ;;  %s232_s22 = scalar_lea.vmem %s909_s3, %s642_s27 }
  0x19   : > { %353 = vmatpush1.bf16.msra.mxu0 %v712_v6  ;;  %657 = vmatpush1.bf16.msra.mxu1 %v712_v6 }
  0x1a   : > { %354 = vmatprep.subr.bf16.mxu0 %v713_v7  ;;  %650 = vmatprep.subr.bf16.mxu1 %v713_v7 }
  0x1d   : > { %355 = vmatpush1.bf16.msra.mxu0 %v715_v8  ;;  %658 = vmatpush1.bf16.msra.mxu1 %v715_v8 }
  0x1e   : > { %356 = vmatprep.subr.bf16.mxu0 %v716_v9  ;;  %651 = vmatprep.subr.bf16.mxu1 %v716_v9 }
  0x21   : > { %357 = vmatpush1.bf16.msra.mxu0 %v718_v10  ;;  %659 = vmatpush1.bf16.msra.mxu1 %v718_v10 }
  0x22   : > { %358 = vmatprep.subr.bf16.mxu0 %v719_v11  ;;  %652 = vmatprep.subr.bf16.mxu1 %v719_v11 }
  0x25   : > { %359 = vmatpush1.bf16.msra.mxu0 %v721_v12  ;;  %660 = vmatpush1.bf16.msra.mxu1 %v721_v12 }
  0x26   : > { %360 = vmatprep.subr.bf16.mxu0 %v722_v13  ;;  %653 = vmatprep.subr.bf16.mxu1 %v722_v13 }
  0x29   : > { %361 = vmatpush1.bf16.msra.mxu0 %v724_v14  ;;  %661 = vmatpush1.bf16.msra.mxu1 %v724_v14 }
  0x2a   : > { %362 = vmatprep.subr.bf16.mxu0 %v725_v15  ;;  %654 = vmatprep.subr.bf16.mxu1 %v725_v15 }
  0x2d   : > { %363 = vmatpush1.bf16.msra.mxu0 %v727_v16  ;;  %662 = vmatpush1.bf16.msra.mxu1 %v727_v16 }
  0x30   : > { %381 = vmatmul.mubr.bf16.vlgmr.msra.gmra.mxu0 %v728_v17  ;;  %391 = vmatmul.mubr.bf16.vlgmr.msra.gmra.mxu1 %v729_v18 }
  0xf0   : > { %v382_v19 = vpop.f32.mrf.mxu0  ;;  %v392_v20 = vpop.f32.mrf.mxu1 }
  0xf1   : > { %v447_v27 = vmul.f32 %v382_v19, %v382_v19  ;;  %v451_v30 = vmul.f32 %v392_v20, %v392_v20 }
  0xf2   : > { %v384_v21 = vpop.f32.mrf.mxu0  ;;  %v394_v22 = vpop.f32.mrf.mxu1 }
  0xf3   : > { %v643_v23 = vpack.c.bf16 %v384_v21, %v382_v19  ;;  %v645_v24 = vpack.c.bf16 %v394_v22, %v392_v20  ;;  %v448_v37 = vmul.f32 %v384_v21, %v384_v21  ;;  %v452_v44 = vmul.f32 %v394_v22, %v394_v22 }
  0xf4   : > { %v386_v25 = vpop.f32.mrf.mxu0  ;;  %v396_v26 = vpop.f32.mrf.mxu1 }
  0xf5   : > { %425 = vst [vmem:[%s222_s20] sm:$0xff] %v643_v23  ;;  %427 = vst [vmem:[%s222_s20 + $0x10] sm:$0xff] %v645_v24  ;;  %v429_v28 = vadd.f32 %v386_v25, %v382_v19  ;;  %v449_v29 = vmul.f32 %v386_v25, %v386_v25  ;;  %v453_v41 = vmul.f32 %v396_v26, %v396_v26 }
  0xf6   : > { %v388_v31 = vpop.f32.mrf.mxu0  ;;  %v398_v32 = vpop.f32.mrf.mxu1 }
  0xf7   : > { %v455_v33 = vadd.f32 %v449_v29, %v447_v27  ;;  %v430_v34 = vadd.f32 %v429_v28, %v392_v20  ;;  %v644_v35 = vpack.c.bf16 %v388_v31, %v386_v25  ;;  %v438_v36 = vadd.f32 %v388_v31, %v384_v21 }
  0xf8   : > { %v450_v38 = vmul.f32 %v388_v31, %v388_v31  ;;  %v646_v39 = vpack.c.bf16 %v398_v32, %v396_v26  ;;  %v454_v49 = vmul.f32 %v398_v32, %v398_v32 }
  0xf9   : > { %v431_v40 = vadd.f32 %v430_v34, %v396_v26  ;;  %v456_v42 = vadd.f32 %v455_v33, %v451_v30  ;;  %426 = vst [vmem:[%s222_s20 + $0x8] sm:$0xff] %v644_v35  ;;  %v439_v43 = vadd.f32 %v438_v36, %v394_v22 }
  0xfa   : > { %v464_v45 = vadd.f32 %v450_v38, %v448_v37  ;;  %428 = vst [vmem:[%s222_s20 + $0x18] sm:$0xff] %v646_v39 }
  0xfb   : > { %v432_v46 = vrot.slane %v431_v40, 4  ;;  %v457_v47 = vadd.f32 %v456_v42, %v453_v41  ;;  %v440_v48 = vadd.f32 %v439_v43, %v398_v32 }
  0xfc   : > { %v465_v50 = vadd.f32 %v464_v45, %v452_v44 }
  0xfd   : > { %v433_v51 = vadd.f32 %v432_v46, %v431_v40  ;;  %v458_v52 = vrot.slane %v457_v47, 4  ;;  %v441_v53 = vrot.slane %v440_v48, 4 }
  0xfe   : > { %v466_v54 = vadd.f32 %v465_v50, %v454_v49 }
  0xff   : > { %v434_v55 = vrot.slane %v433_v51, 2  ;;  %v459_v56 = vadd.f32 %v458_v52, %v457_v47  ;;  %v442_v57 = vadd.f32 %v441_v53, %v440_v48 }
 0x100   : > { %v467_v58 = vrot.slane %v466_v54, 4 }
 0x101   : > { %v435_v59 = vadd.f32 %v434_v55, %v433_v51  ;;  %v460_v60 = vrot.slane %v459_v56, 2  ;;  %v443_v61 = vrot.slane %v442_v57, 2 }
 0x102   : > { %v468_v62 = vadd.f32 %v467_v58, %v466_v54 }
 0x103   : > { %v436_v63 = vrot.slane %v435_v59, 1  ;;  %v461_v0 = vadd.f32 %v460_v60, %v459_v56  ;;  %v444_v1 = vadd.f32 %v443_v61, %v442_v57 }
 0x104   : > { %v469_v2 = vrot.slane %v468_v62, 2 }
 0x105   : > { %v462_v3 = vrot.slane %v461_v0, 1  ;;  %v445_v4 = vrot.slane %v444_v1, 1  ;;  %v437_v6 = vadd.f32 %v436_v63, %v435_v59 }
 0x106   : > { %v470_v5 = vadd.f32 %v469_v2, %v468_v62 }
 0x107   : > { %v463_v7 = vadd.f32 %v462_v3, %v461_v0  ;;  %v446_v10 = vadd.f32 %v445_v4, %v444_v1 }
 0x108   : > { %v471_v8 = vrot.slane %v470_v5, 1 }
 0x109   : > { %v474_v9 = vsel %vm473_vm0, %v437_v6, %v463_v7 }
 0x10a   : > { %v472_v11 = vadd.f32 %v471_v8, %v470_v5  ;;  %v477_v12 = vsel %vm476_vm1, %v474_v9, 0.0 }
 0x10b   : > { %479 = vst [vmem:[%s232_s22] sm:$0xff] %v477_v12 }
 0x10c   : > { %v475_v13 = vsel %vm473_vm0, %v446_v10, %v472_v11 }
 0x10d   : > { %v478_v14 = vsel %vm476_vm1, %v475_v13, 0.0 }
 0x10e   : > { %480 = vst [vmem:[%s232_s22 + $0x8] sm:$0xff] %v478_v14 }
 0x10f PF: > { %s14_s16 = sadd.s32 1, %s768_s16   ;;  %s910_s12 = smov %s760_s14 }
 0x110   : > { %p11_p7 = scmp.ge.s32.totalorder %s14_s16, 6   ;;  %s911_s13 = smov %s764_s15 }
 0x111   : > { %s912_s14 = smov %s915_s17  ;;  %s913_s15 = smov %s919_s18 }
 0x112   :  { %13 = sbr.rel (!%p11_p7) target bundleno = 3 (0x3), region = 70 }

// kernel: conv_res_block.5
= control target key start
LH: loop header
LB: loop body
LE: loop exit
PB: predicated region body
PF: predicated region fallthrough
CT: control target
= control target key end

     0   :  { %s718_s17 = smov 0   ;;  %s720_s18 = smov 0   ;;  %s801_s0 = inlined_call_operand.vmem [shape: bf16[2,8,8,256], index: 0, kind: input, shape index: {}]   ;;  %s802_s1 = inlined_call_operand.vmem [shape: f32[2,256], index: 1, kind: input, shape index: {}]   ;;  %s803_s2 = inlined_call_operand.<no memory space> [shape: f32[1,1], index: 2, kind: input, shape index: {}]   ;;  %s804_s3 = inlined_call_operand.vmem [shape: bf16[2,8,10,128], index: 3, kind: output, shape index: {0}]   ;;  %s805_s4 = inlined_call_operand.vmem [shape: bf16[2,8,8,128], index: 4, kind: output, shape index: {1}]  }
   0x1   :  { %10 = sst [smem:[#allocation2]] %s803_s2  ;;  %s722_s19 = smov 0  }
   0x2   :  { %s724_s20 = smov 0   ;;  %s726_s21 = smov 0  }
   0x3 LB: > { %s25_s2 = sadd.s32 1, %s680_s19  ;;  %s28_s22 = sadd.s32 1, %s684_s20  ;;  %s688_s21 = sphi %s726_s21, %s16_s21   ;;  %s684_s20 = sphi %s724_s20, %s809_s20   ;;  %s680_s19 = sphi %s722_s19, %s808_s19   ;;  %s676_s18 = sphi %s720_s18, %s807_s18   ;;  %s672_s17 = sphi %s718_s17, %s806_s17  }
   0x4   : > { %p26_p0 = scmp.ge.s32.totalorder %s25_s2, 2  ;;  %p569_p1 = scmp.ge.s32.totalorder %s688_s21, 1 }
   0x5   : > { %p190_p2 = scmp.lt.s32.totalorder %s688_s21, 5 }
   0x6   : > { %s811_s2 = smov (%p26_p0, %s25_s2), 0  ;;  %s813_s22 = smov (!%p26_p0, %s28_s22), %s684_s20 }
   0x7   : > { %p191_p3 = pnand %p569_p1, %p190_p2  ;;  %p30_p4 = scmp.ge.s32.totalorder %s813_s22, 2 }
   0x8   : > { %s570_s23 = sshll.u32 (!%p191_p3), %s672_s17, 2  ;;  %p236_p5 = scmp.lt.s32.totalorder (!%p191_p3), %s676_s18, 1 }
   0x9   : > { %s815_s22 = smov (%p30_p4, %s813_s22), 0  ;;  %194 = sbr.rel (%p191_p3) target bundleno = 40 (0x28), region = 32 }
   0xa   : > { %p238_p6 = scmp.lt.s32.totalorder (!%p191_p3), %s570_s23, 7  ;;  %s333_s24 = sld [smem:[#allocation2]] (!%p191_p3) }
   0xe   : > { %v281_v0 = vlaneseq  ;;  %s817_s18 = smov (!%p236_p5, %s676_s18), 1  ;;  %s819_s23 = smov (!%p238_p6, %s570_s23), 7  ;;  %v279_v2 = vld [vmem:[%s802_s1] sm:$0xf]  ;;  %vm359_vm0 = vcmask 1040384  }
   0xf   : > { %s572_s27 = sshll.u32 %s817_s18, 4  ;;  %s571_s28 = sshll.u32 %s819_s23, 1 }
  0x10   : > { %v282_v1 = vshrl.u32 %v281_v0, 7  ;;  %s757_s29 = sadd.s32 %s572_s27, %s571_s28  ;;  %s579_s8 = sshll.u32 %s817_s18, 3  ;;  %v338_v15 = vstv %s333_s24 }
  0x11   : > { %s573_s30 = sshll.u32 %s757_s29, 2  ;;  %s767_s9 = sadd.s32 %s579_s8, %s819_s23 }
  0x12   : > { %v283_v3 = vsub.s32 0, %v282_v1  ;;  %v309_v4 = vsub.s32 1, %v282_v1  ;;  %v287_v5 = vsub.s32 2, %v282_v1  ;;  %v313_v6 = vsub.s32 3, %v282_v1  ;;  %s244_s7 = scalar_lea.vmem %s801_s0, %s573_s30  ;;  %s580_s10 = sshll.u32 %s767_s9, 2 }
  0x13   : > { %v267_v13 = vld [vmem:[%s244_s7] sm:$0xff]  ;;  %v268_v16 = vld [vmem:[%s244_s7 + $0x8] sm:$0xff]  ;;  %v269_v17 = vld [vmem:[%s244_s7 + $0x10] sm:$0xff]  ;;  %s265_s13 = scalar_lea.vmem %s805_s4, %s580_s10  ;;  %s255_s16 = scalar_lea.vmem %s804_s3, %s573_s30 }
  0x14   : > { %v284_v7 = vrot.slane %v279_v2, %v283_v3  ;;  %v310_v8 = vrot.slane %v279_v2, %v309_v4  ;;  %v288_v9 = vrot.slane %v279_v2, %v287_v5  ;;  %v314_v10 = vrot.slane %v279_v2, %v313_v6  ;;  %v270_v22 = vld [vmem:[%s244_s7 + $0x18] sm:$0xff] }
  0x15   : > { %v271_v19 = vunpack.c.l.bf16 %v267_v13  ;;  %v273_v20 = vunpack.c.l.bf16 %v268_v16  ;;  %v275_v21 = vunpack.c.l.bf16 %v269_v17  ;;  %v272_v23 = vunpack.c.h.bf16 %v267_v13 }
  0x16   : > { %v294_v11 = vrot.slane %v284_v7, %v283_v3  ;;  %v298_v12 = vrot.slane %v288_v9, %v283_v3  ;;  %v320_v14 = vrot.slane %v310_v8, %v309_v4  ;;  %v324_v18 = vrot.slane %v314_v10, %v309_v4 }
  0x17   : > { %v277_v24 = vunpack.c.l.bf16 %v270_v22  ;;  %v274_v25 = vunpack.c.h.bf16 %v268_v16  ;;  %v276_v26 = vunpack.c.h.bf16 %v269_v17  ;;  %v278_v27 = vunpack.c.h.bf16 %v270_v22 }
  0x18   : > { %v299_v28 = vmul.f32 %v294_v11, %v271_v19  ;;  %v301_v29 = vmul.f32 %v294_v11, %v273_v20  ;;  %v303_v30 = vmul.f32 %v294_v11, %v275_v21  ;;  %v300_v31 = vmul.f32 %v298_v12, %v272_v23 }
  0x19   : > { %v305_v32 = vmul.f32 %v294_v11, %v277_v24  ;;  %v302_v33 = vmul.f32 %v298_v12, %v274_v25  ;;  %v304_v34 = vmul.f32 %v298_v12, %v276_v26  ;;  %v306_v35 = vmul.f32 %v298_v12, %v278_v27 }
  0x1a   : > { %v325_v36 = vadd.f32 %v320_v14, %v299_v28  ;;  %v327_v37 = vadd.f32 %v320_v14, %v301_v29  ;;  %v329_v38 = vadd.f32 %v320_v14, %v303_v30  ;;  %v326_v39 = vadd.f32 %v324_v18, %v300_v31 }
  0x1b   : > { %v331_v40 = vadd.f32 %v320_v14, %v305_v32  ;;  %v328_v41 = vadd.f32 %v324_v18, %v302_v33  ;;  %v330_v42 = vadd.f32 %v324_v18, %v304_v34  ;;  %v332_v43 = vadd.f32 %v324_v18, %v306_v35 }
  0x1c   : > { %vm334_vm1 = vcmp.gt.f32.partialorder %v325_v36, 0.0  ;;  %v339_v44 = vmul.f32 %v338_v15, %v325_v36  ;;  %vm335_vm2 = vcmp.gt.f32.partialorder %v327_v37, 0.0  ;;  %v340_v45 = vmul.f32 %v338_v15, %v327_v37 }
  0x1d   : > { %vm336_vm3 = vcmp.gt.f32.partialorder %v329_v38, 0.0  ;;  %v341_v46 = vmul.f32 %v338_v15, %v329_v38  ;;  %vm337_vm4 = vcmp.gt.f32.partialorder %v331_v40, 0.0  ;;  %v342_v47 = vmul.f32 %v338_v15, %v331_v40 }
  0x1e   : > { %v343_v48 = vsel %vm334_vm1, %v325_v36, %v339_v44  ;;  %v344_v49 = vsel %vm335_vm2, %v327_v37, %v340_v45  ;;  %v602_v50 = vpack.c.bf16 %v328_v41, %v326_v39  ;;  %v607_v51 = vpack.c.bf16 %v332_v43, %v330_v42 }
  0x1f   : > { %v351_v52 = vrot.slane %v343_v48, 7  ;;  %v352_v53 = vrot.slane %v344_v49, 7  ;;  %v345_v54 = vsel %vm336_vm3, %v329_v38, %v341_v46  ;;  %v346_v55 = vsel %vm337_vm4, %v331_v40, %v342_v47 }
  0x20   : > { %v353_v56 = vrot.slane %v345_v54, 7  ;;  %v354_v57 = vrot.slane %v346_v55, 7  ;;  %603 = vst [vmem:[%s265_s13] sm:$0xff] %v602_v50   ;;  %609 = vst [vmem:[%s265_s13 + $0x8] sm:$0xff] %v607_v51  }
  0x21   : > { %v360_v58 = vsel %vm359_vm0, 0.0, %v351_v52  ;;  %v364_v59 = vsel %vm359_vm0, %v351_v52, 0.0  ;;  %v361_v60 = vsel %vm359_vm0, 0.0, %v352_v53  ;;  %v365_v61 = vsel %vm359_vm0, %v352_v53, 0.0 }
  0x22   : > { %v591_v62 = vpack.c.bf16 %v360_v58, %v360_v58  ;;  %v592_v63 = vpack.c.bf16 %v364_v59, %v364_v59  ;;  %v593_v0 = vpack.c.bf16 %v361_v60, %v361_v60  ;;  %v594_v1 = vpack.c.bf16 %v365_v61, %v365_v61 }
  0x23   : > { %v362_v2 = vsel %vm359_vm0, 0.0, %v353_v56  ;;  %v366_v3 = vsel %vm359_vm0, %v353_v56, 0.0  ;;  %v363_v4 = vsel %vm359_vm0, 0.0, %v354_v57  ;;  %v367_v5 = vsel %vm359_vm0, %v354_v57, 0.0 }
  0x24   : > { %400 = vst [vmem:[%s255_s16] sm:$0xf] %v591_v62  ;;  %401 = vst [vmem:[%s255_s16 + $0x4] sm:$0x1] %v592_v63  ;;  %v595_v6 = vpack.c.bf16 %v362_v2, %v362_v2  ;;  %v596_v7 = vpack.c.bf16 %v366_v3, %v366_v3  ;;  %v597_v8 = vpack.c.bf16 %v363_v4, %v363_v4 }
  0x25   : > { %402 = vst [vmem:[%s255_s16 + $0x8] sm:$0xf] %v593_v0  ;;  %403 = vst [vmem:[%s255_s16 + $0xc] sm:$0x1] %v594_v1  ;;  %v598_v9 = vpack.c.bf16 %v367_v5, %v367_v5 }
  0x26   : > { %404 = vst [vmem:[%s255_s16 + $0x10] sm:$0xf] %v595_v6  ;;  %405 = vst [vmem:[%s255_s16 + $0x14] sm:$0x1] %v596_v7 }
  0x27   : > { %406 = vst [vmem:[%s255_s16 + $0x18] sm:$0xf] %v597_v8  ;;  %407 = vst [vmem:[%s255_s16 + $0x1c] sm:$0x1] %v598_v9 }
  0x28 PF: > { %s16_s21 = sadd.s32 1, %s688_s21   ;;  %s806_s17 = smov %s680_s19 }
  0x29   : > { %p13_p7 = scmp.ge.s32.totalorder %s16_s21, 6   ;;  %s807_s18 = smov %s684_s20 }
  0x2a   : > { %s808_s19 = smov %s811_s2  ;;  %s809_s20 = smov %s815_s22 }
  0x2b   :  { %15 = sbr.rel (!%p13_p7) target bundleno = 3 (0x3), region = 74 }

// kernel: conv_res_block.7
= control target key start
LH: loop header
LB: loop body
LE: loop exit
PB: predicated region body
PF: predicated region fallthrough
CT: control target
= control target key end

     0   :  { %9 = vsyncpa [#allocation3], 0  ;;  %s649_s15 = smov 0   ;;  %s651_s16 = smov 0   ;;  %s739_s0 = inlined_call_operand.vmem [shape: bf16[2,8,8,128], index: 0, kind: input, shape index: {}]   ;;  %s740_s1 = inlined_call_operand.vmem [shape: bf16[2,8,8,128], index: 1, kind: input, shape index: {}]   ;;  %s741_s2 = inlined_call_operand.vmem [shape: f32[2,128], index: 2, kind: input, shape index: {}]   ;;  %s742_s3 = inlined_call_operand.vmem [shape: f32[1,2], index: 3, kind: input, shape index: {}]   ;;  %s743_s4 = inlined_call_operand.vmem [shape: f32[2,8,8,128], index: 4, kind: output, shape index: {}]  }
   0x1   :  { %s653_s17 = smov 0   ;;  %s655_s18 = smov 0  }
   0x2   :  { %s657_s19 = smov 0  }
   0x3 LB: > { %s476_s20 = sadd.s32 4294967295, %s621_s19   ;;  %s24_s21 = sadd.s32 1, %s613_s17  ;;  %s621_s19 = sphi %s657_s19, %s15_s19   ;;  %s617_s18 = sphi %s655_s18, %s749_s18   ;;  %s613_s17 = sphi %s653_s17, %s748_s17   ;;  %s609_s16 = sphi %s651_s16, %s747_s16   ;;  %s605_s15 = sphi %s649_s15, %s746_s15  }
   0x4   : > { %p25_p0 = scmp.ge.s32.totalorder %s24_s21, 2  ;;  %s27_s22 = sadd.s32 1, %s617_s18 }
   0x5   : > { %p478_p1 = scmp.ge.s32.totalorder %s621_s19, 1  ;;  %p158_p2 = scmp.lt.s32.totalorder %s621_s19, 5 }
   0x6   : > { %s751_s21 = smov (%p25_p0, %s24_s21), 0  ;;  %s753_s22 = smov (!%p25_p0, %s27_s22), %s617_s18 }
   0x7   : > { %p682_p3 = pnand %p478_p1, %p158_p2  ;;  %p29_p4 = scmp.ge.s32.totalorder %s753_s22, 2 }
   0x8   : > { %p686_p5 = scmp.eq.s32.totalorder %s476_s20, 0  ;;  %s174_s27 = sshll.u32 %s742_s3, 4  ;;  %s175_s27 = int_to_ptr.vmem [resolvable:$true] %s174_s27 }
   0x9   : > { %p517_p6 = pneg %p682_p3  ;;  %s755_s22 = smov (%p29_p4, %s753_s22), 0 }
   0xa   : > { %s564_s28 = scalar_lea.vmem %s175_s27, 16  ;;  %p572_p12 = scmp.lt.s32.totalorder %s175_s27, %s175_s27 }
   0xb   : > { %p518_p7 = pnand %p686_p5, %p517_p6  ;;  %p565_p8 = scmp.ne.s32.totalorder %s175_s27, %s564_s28 }
   0xc   : > { %p573_p13 = scmp.lt.s32.totalorder %s564_s28, %s564_s28 }
   0xd   : > { %p566_p9 = pneg %p518_p7 }
   0xe   : > { %p574_p0 = por %p573_p13, %p572_p12 }
   0xf   : > { %p567_p10 = pnand %p566_p9, %p565_p8 }
  0x11   : > { %p568_p11 = pneg %p567_p10 }
  0x13   : > { %p575_p1 = pnand %p574_p0, %p568_p11 }
  0x15   : > { %578 = shalt.err (!%p575_p1)
}
  0x16   : > { %s623_s29 = smov [#allocation2]   ;;  %213 = sbr.rel (%p682_p3) target bundleno = 54 (0x36), region = 36 }
  0x17   : > { %520 = dma.vmem_to_smem (!%p518_p7), %s175_s27, 16, %s623_s29, [#allocation3]  }
  0x1b   : > { %600 = dma.done.wait (%p686_p5), [#allocation3], 16  }
  0x1c   : > { %602 = vsyncadd (%p686_p5), [#allocation3], 4294967280 }
  0x1d   : > { %219 = sfence }
  0x1e   : > { %s483_s30 = sshll.u32 %s605_s15, 2  ;;  %p258_p2 = scmp.lt.s32.totalorder %s609_s16, 1  ;;  %v296_v0 = vlaneseq  ;;  %v295_v2 = vld [vmem:[%s741_s2] sm:$0x3] }
  0x1f   : > { %p260_p4 = scmp.lt.s32.totalorder %s483_s30, 7  ;;  %s312_s8 = sld [smem:[#allocation2]] }
  0x20   : > { %s757_s16 = smov (!%p258_p2, %s609_s16), 1  ;;  %v297_v1 = vshrl.u32 %v296_v0, 7 }
  0x21   : > { %s759_s30 = smov (!%p260_p4, %s483_s30), 7  ;;  %s484_s7 = sshll.u32 %s757_s16, 3 }
  0x22   : > { %v298_v3 = vsub.s32 0, %v297_v1  ;;  %v306_v4 = vsub.s32 1, %v297_v1  ;;  %s711_s9 = sadd.s32 %s484_s7, %s759_s30  ;;  %s492_s16 = sld [smem:[#allocation2 + $0x1]] }
  0x23   : > { %s485_s10 = sshll.u32 %s711_s9, 2  ;;  %s491_s23 = sshll.u32 %s711_s9, 3 }
  0x24   : > { %s265_s13 = scalar_lea.vmem %s739_s0, %s485_s10  ;;  %v299_v5 = vrot.slane %v295_v2, %v298_v3  ;;  %s275_s20 = scalar_lea.vmem %s740_s1, %s485_s10  ;;  %v307_v8 = vrot.slane %v295_v2, %v306_v4 }
  0x25   : > { %v496_v6 = vld [vmem:[%s265_s13] sm:$0xff]   ;;  %v511_v7 = vld [vmem:[%s265_s13 + $0x8] sm:$0xff]   ;;  %v318_v19 = vstv %s312_s8  ;;  %s285_s26 = scalar_lea.vmem %s743_s4, %s491_s23 }
  0x26   : > { %v497_v9 = vunpack.c.l.bf16 %v496_v6  ;;  %v498_v10 = vunpack.c.h.bf16 %v496_v6  ;;  %v501_v11 = vunpack.c.l.bf16 %v511_v7  ;;  %v502_v12 = vunpack.c.h.bf16 %v511_v7  ;;  %v504_v17 = vld [vmem:[%s275_s20] sm:$0xff]   ;;  %v512_v18 = vld [vmem:[%s275_s20 + $0x8] sm:$0xff]  }
  0x27   : > { %v505_v24 = vunpack.c.l.bf16 %v504_v17  ;;  %v506_v25 = vunpack.c.h.bf16 %v504_v17  ;;  %v509_v26 = vunpack.c.l.bf16 %v512_v18  ;;  %v510_v27 = vunpack.c.h.bf16 %v512_v18 }
  0x28   : > { %v300_v13 = vmul.f32 %v497_v9, %v299_v5  ;;  %v301_v14 = vmul.f32 %v498_v10, %v299_v5  ;;  %v302_v15 = vmul.f32 %v501_v11, %v299_v5  ;;  %v303_v16 = vmul.f32 %v502_v12, %v299_v5 }
  0x29   : > { %v343_v33 = vstv %s492_s16 }
  0x2a   : > { %v308_v20 = vadd.f32 %v307_v8, %v300_v13  ;;  %v309_v21 = vadd.f32 %v307_v8, %v301_v14  ;;  %v310_v22 = vadd.f32 %v307_v8, %v302_v15  ;;  %v311_v23 = vadd.f32 %v307_v8, %v303_v16 }
  0x2c   : > { %vm314_vm0 = vcmp.gt.f32.partialorder %v308_v20, 0.0  ;;  %v319_v28 = vmul.f32 %v318_v19, %v308_v20  ;;  %vm315_vm1 = vcmp.gt.f32.partialorder %v309_v21, 0.0  ;;  %v320_v29 = vmul.f32 %v318_v19, %v309_v21 }
  0x2d   : > { %vm316_vm2 = vcmp.gt.f32.partialorder %v310_v22, 0.0  ;;  %v321_v30 = vmul.f32 %v318_v19, %v310_v22  ;;  %vm317_vm3 = vcmp.gt.f32.partialorder %v311_v23, 0.0  ;;  %v322_v31 = vmul.f32 %v318_v19, %v311_v23 }
  0x2e   : > { %v323_v32 = vsel %vm314_vm0, %v308_v20, %v319_v28  ;;  %v324_v34 = vsel %vm315_vm1, %v309_v21, %v320_v29 }
  0x2f   : > { %v335_v35 = vadd.f32 %v505_v24, %v323_v32  ;;  %v336_v36 = vadd.f32 %v506_v25, %v324_v34  ;;  %v325_v37 = vsel %vm316_vm2, %v310_v22, %v321_v30  ;;  %v326_v38 = vsel %vm317_vm3, %v311_v23, %v322_v31 }
  0x30   : > { %v337_v39 = vadd.f32 %v509_v26, %v325_v37  ;;  %v338_v40 = vadd.f32 %v510_v27, %v326_v38 }
  0x31   : > { %vm339_vm4 = vcmp.gt.f32.partialorder %v335_v35, 0.0  ;;  %v344_v41 = vmul.f32 %v343_v33, %v335_v35  ;;  %vm340_vm5 = vcmp.gt.f32.partialorder %v336_v36, 0.0  ;;  %v345_v42 = vmul.f32 %v343_v33, %v336_v36 }
  0x32   : > { %vm341_vm6 = vcmp.gt.f32.partialorder %v337_v39, 0.0  ;;  %v346_v43 = vmul.f32 %v343_v33, %v337_v39  ;;  %vm342_vm7 = vcmp.gt.f32.partialorder %v338_v40, 0.0  ;;  %v347_v44 = vmul.f32 %v343_v33, %v338_v40 }
  0x33   : > { %v348_v45 = vsel %vm339_vm4, %v335_v35, %v344_v41  ;;  %v349_v46 = vsel %vm340_vm5, %v336_v36, %v345_v42 }
  0x34   : > { %352 = vst [vmem:[%s285_s26] sm:$0xff] %v348_v45  ;;  %353 = vst [vmem:[%s285_s26 + $0x8] sm:$0xff] %v349_v46  ;;  %v350_v47 = vsel %vm341_vm6, %v337_v39, %v346_v43  ;;  %v351_v48 = vsel %vm342_vm7, %v338_v40, %v347_v44 }
  0x35   : > { %354 = vst [vmem:[%s285_s26 + $0x10] sm:$0xff] %v350_v47  ;;  %355 = vst [vmem:[%s285_s26 + $0x18] sm:$0xff] %v351_v48 }
  0x36 PF: > { %s15_s19 = sadd.s32 1, %s621_s19   ;;  %s746_s15 = smov %s613_s17 }
  0x37   : > { %p12_p3 = scmp.ge.s32.totalorder %s15_s19, 6   ;;  %s747_s16 = smov %s617_s18 }
  0x38   : > { %s748_s17 = smov %s751_s21  ;;  %s749_s18 = smov %s755_s22 }
  0x39   :  { %14 = sbr.rel (!%p12_p3) target bundleno = 3 (0x3), region = 74 }
  0x3e   :  { %386 = vsyncpa [#allocation3], 1 }
  0x3f   :  { %388 = vsyncpa [#allocation3 + $0x1], 1 }

// kernel: conv_res_block.6
= control target key start
LH: loop header
LB: loop body
LE: loop exit
PB: predicated region body
PF: predicated region fallthrough
CT: control target
= control target key end

     0   :  { %s2016_s18 = smov 0   ;;  %s2018_s19 = smov 0   ;;  %s2391_s0 = inlined_call_operand.vmem [shape: bf16[2,8,10,128], index: 0, kind: input, shape index: {}, may-alias: {0,1,2}]   ;;  %s2392_s1 = inlined_call_operand.vmem [shape: bf16[2,8,10,128], index: 1, kind: input, shape index: {}, may-alias: {0,1,2}]   ;;  %s2393_s2 = inlined_call_operand.vmem [shape: bf16[2,8,10,128], index: 2, kind: input, shape index: {}, may-alias: {0,1,2}]   ;;  %s2394_s3 = inlined_call_operand.vmem [shape: bf16[1152,128], index: 3, kind: input, shape index: {}]   ;;  %s2395_s4 = inlined_call_operand.vmem [shape: bf16[2,8,8,128], index: 4, kind: output, shape index: {0}]   ;;  %s2396_s5 = inlined_call_operand.vmem [shape: f32[4,8,128], index: 5, kind: output, shape index: {1}]  }
   0x1   :  { %s2020_s20 = smov 0   ;;  %s2022_s21 = smov 0  }
   0x2   :  { %s2024_s22 = smov 0  }
   0x3 LB: > { %s25_s23 = sadd.s32 1, %s1976_s20  ;;  %s28_s24 = sadd.s32 1, %s1980_s21  ;;  %s1984_s22 = sphi %s2024_s22, %s16_s22   ;;  %s1980_s21 = sphi %s2022_s21, %s2401_s21   ;;  %s1976_s20 = sphi %s2020_s20, %s2400_s20   ;;  %s1972_s19 = sphi %s2018_s19, %s2399_s19   ;;  %s1968_s18 = sphi %s2016_s18, %s2398_s18  }
   0x4   : > { %p26_p0 = scmp.ge.s32.totalorder %s25_s23, 2  ;;  %p1566_p1 = scmp.ge.s32.totalorder %s1984_s22, 1 }
   0x5   : > { %p280_p2 = scmp.lt.s32.totalorder %s1984_s22, 5 }
   0x6   : > { %s2403_s23 = smov (%p26_p0, %s25_s23), 0  ;;  %s2405_s24 = smov (!%p26_p0, %s28_s24), %s1980_s21 }
   0x7   : > { %p281_p3 = pnand %p1566_p1, %p280_p2  ;;  %p30_p4 = scmp.ge.s32.totalorder %s2405_s24, 2 }
   0x8   : > { %s2066_s10 = sshll.u32 (!%p281_p3), %s1968_s18, 2  ;;  %p350_p6 = scmp.lt.s32.totalorder (!%p281_p3), %s1972_s19, 1 }
   0x9   : > { %s2407_s24 = smov (%p30_p4, %s2405_s24), 0  ;;  %284 = sbr.rel (%p281_p3) target bundleno = 336 (0x150), region = 36 }
   0xa   : > { %s1572_s17 = sadd.s32 (!%p281_p3), 4294967295, %s2066_s10  ;;  %p352_p8 = scmp.lt.s32.totalorder (!%p281_p3), %s2066_s10, 7 }
   0xb   : > { %p362_p5 = scmp.gt.s32.totalorder (!%p281_p3), %s1572_s17, 0  ;;  %p1573_p7 = scmp.lt.s32.totalorder (!%p281_p3), %s1572_s17, 7 }
   0xc   : > { %p413_p9 = scmp.gt.s32.totalorder (!%p281_p3), %s1968_s18, 0  ;;  %s1677_s13 = sadd.s32 (!%p281_p3), 4, %s2066_s10 }
   0xd   : > { %p2198_p10 = scmp.lt.s32.totalorder (!%p281_p3), %s1677_s13, 7  ;;  %p416_p11 = scmp.lt.s32.totalorder (!%p281_p3), %s1968_s18, 1 }
   0xe   : > { %v1871_v0 = vld [vmem:[%s2394_s3 + $0x78] sm:$0xff]   ;;  %v1875_v4 = vld [vmem:[%s2394_s3 + $0x70] sm:$0xff]   ;;  %v1879_v8 = vld [vmem:[%s2394_s3 + $0x68] sm:$0xff]   ;;  %s363_s11 = scalar_select %p362_p5, %s1572_s17, 0  ;;  %vm457_vm0 = vcmask 1046528   ;;  %vm474_vm1 = vcmask 1045504  }
   0xf   : > { %v1872_v1 = vld [vmem:[%s2394_s3 + $0xf8] sm:$0xff]   ;;  %1689 = vmatprep.subr.bf16.mxu0 %v1871_v0  ;;  %v1876_v5 = vld [vmem:[%s2394_s3 + $0xf0] sm:$0xff]   ;;  %v1880_v9 = vld [vmem:[%s2394_s3 + $0xe8] sm:$0xff]   ;;  %s2107_s26 = scalar_select %p350_p6, %s1972_s19, 1  ;;  %vm1377_vm2 = vcmask 1040384   ;;  %vm1379_vm3 = vcmask 1041408  }
  0x10   : > { %v1873_v2 = vld [vmem:[%s2394_s3 + $0x38] sm:$0xff]   ;;  %1717 = vmatprep.subr.bf16.mxu1 %v1872_v1  ;;  %v1877_v6 = vld [vmem:[%s2394_s3 + $0x30] sm:$0xff]   ;;  %v1881_v10 = vld [vmem:[%s2394_s3 + $0x28] sm:$0xff]   ;;  %s2409_s11 = smov (!%p1573_p7, %s363_s11), 7  ;;  %s2411_s13 = smov (!%p2198_p10, %s1677_s13), 7 }
  0x11   : > { %v1874_v3 = vld [vmem:[%s2394_s3 + $0xb8] sm:$0xff]   ;;  %1690 = vmatpush3.bf16.msra.mxu0 %v1873_v2  ;;  %v1878_v7 = vld [vmem:[%s2394_s3 + $0xb0] sm:$0xff]   ;;  %v1882_v11 = vld [vmem:[%s2394_s3 + $0xa8] sm:$0xff]   ;;  %s2117_s6 = scalar_select %p352_p8, %s2066_s10, 7 }
  0x12   : > { %1718 = vmatpush3.bf16.msra.mxu1 %v1874_v3  ;;  %1691 = vmatprep.subr.bf16.mxu0 %v1875_v4  ;;  %v1883_v12 = vld [vmem:[%s2394_s3 + $0x60] sm:$0xff]   ;;  %v1887_v16 = vld [vmem:[%s2394_s3 + $0x58] sm:$0xff]   ;;  %s2126_s17 = sshll.u32 %s2107_s26, 4  ;;  %v1891_v20 = vld [vmem:[%s2394_s3 + $0x50] sm:$0xff]   ;;  %s1578_s15 = sshll.u32 %s2409_s11, 1 }
  0x13   : > { %1719 = vmatprep.subr.bf16.mxu1 %v1876_v5  ;;  %v1884_v13 = vld [vmem:[%s2394_s3 + $0xe0] sm:$0xff]   ;;  %v1888_v17 = vld [vmem:[%s2394_s3 + $0xd8] sm:$0xff]   ;;  %v1892_v21 = vld [vmem:[%s2394_s3 + $0xd0] sm:$0xff]   ;;  %s1568_s27 = sshll.u32 %s2117_s6, 1  ;;  %s370_s8 = sadd.s32 %s1578_s15, %s2126_s17 }
  0x14   : > { %v1885_v14 = vld [vmem:[%s2394_s3 + $0x20] sm:$0xff]   ;;  %v1889_v18 = vld [vmem:[%s2394_s3 + $0x18] sm:$0xff]   ;;  %v1893_v22 = vld [vmem:[%s2394_s3 + $0x10] sm:$0xff]   ;;  %s356_s12 = sadd.s32 %s2126_s17, %s1568_s27  ;;  %s1580_s28 = sshll.u32 %s370_s8, 2 }
  0x15   : > { %1692 = vmatpush3.bf16.msra.mxu0 %v1877_v6  ;;  %v1886_v15 = vld [vmem:[%s2394_s3 + $0xa0] sm:$0xff]   ;;  %v1890_v19 = vld [vmem:[%s2394_s3 + $0x98] sm:$0xff]   ;;  %v1894_v23 = vld [vmem:[%s2394_s3 + $0x90] sm:$0xff]   ;;  %s1570_s30 = sshll.u32 %s356_s12, 2  ;;  %s372_s8 = scalar_lea.vmem %s2392_s1, %s1580_s28 }
  0x16   : > { %1720 = vmatpush3.bf16.msra.mxu1 %v1878_v7  ;;  %1693 = vmatprep.subr.bf16.mxu0 %v1879_v8  ;;  %v1895_v24 = vld [vmem:[%s2394_s3 + $0x48] sm:$0xff]   ;;  %v1899_v28 = vld [vmem:[%s2394_s3 + $0x40] sm:$0xff]   ;;  %s2171_s15 = scalar_lea.vmem %s2391_s0, %s1570_s30  ;;  %v1904_v42 = vld [vmem:[%s2394_s3 + $0x178] sm:$0xff]   ;;  %s2413_s13 = smov (!%p2198_p10, %s2411_s13), 7 }
  0x17   : > { %1721 = vmatprep.subr.bf16.mxu1 %v1880_v9  ;;  %v1896_v25 = vld [vmem:[%s2394_s3 + $0xc8] sm:$0xff]   ;;  %v1900_v29 = vld [vmem:[%s2394_s3 + $0xc0] sm:$0xff]   ;;  %s414_s28 = scalar_select %p413_p9, 1, 0  ;;  %v1906_v50 = vld [vmem:[%s2394_s3 + $0x1f8] sm:$0xff]  }
  0x18   : > { %v1897_v26 = vld [vmem:[%s2394_s3 + $0x8] sm:$0xff]   ;;  %v1901_v30 = vld [vmem:[%s2394_s3] sm:$0xff]   ;;  %v1905_v57 = vld [vmem:[%s2394_s3 + $0x138] sm:$0xff]   ;;  %s1585_s27 = sshll.u32 %s2413_s13, 1  ;;  %s1589_s10 = sshll.u32 %s2107_s26, 3 }
  0x19   : > { %1694 = vmatpush3.bf16.msra.mxu0 %v1881_v10  ;;  %v1898_v27 = vld [vmem:[%s2394_s3 + $0x88] sm:$0xff]   ;;  %v1902_v31 = vld [vmem:[%s2394_s3 + $0x80] sm:$0xff]   ;;  %s415_s30 = scvt.s32.f32 %s414_s28  ;;  %v1907_v60 = vld [vmem:[%s2394_s3 + $0x1b8] sm:$0xff]   ;;  %s387_s13 = sadd.s32 %s1585_s27, %s2126_s17 }
  0x1a   : > { %1722 = vmatpush3.bf16.msra.mxu1 %v1882_v11  ;;  %1695 = vmatprep.subr.bf16.mxu0 %v1883_v12  ;;  %v419_v32 = vld [vmem:[%s372_s8] sm:$0xf]  ;;  %v420_v33 = vld [vmem:[%s372_s8 + $0x4] sm:$0x1]  ;;  %v2179_v38 = vld [vmem:[%s2171_s15 + $0x8] sm:$0xf] }
  0x1b   : > { %1723 = vmatprep.subr.bf16.mxu1 %v1884_v13  ;;  %v421_v34 = vunpack.c.l.bf16 %v419_v32  ;;  %v422_v35 = vunpack.c.l.bf16 %v420_v33  ;;  %v433_v36 = vld [vmem:[%s2171_s15] sm:$0xf]  ;;  %v434_v37 = vld [vmem:[%s2171_s15 + $0x4] sm:$0x1]  ;;  %v423_v43 = vstv %s415_s30  ;;  %v436_v61 = vld [vmem:[%s2171_s15 + $0xc] sm:$0x1]  ;;  %v443_v5 = vunpack.c.l.bf16 %v2179_v38 }
  0x1c   : > { %v441_v39 = vunpack.c.l.bf16 %v433_v36  ;;  %v442_v40 = vunpack.c.l.bf16 %v434_v37  ;;  %v1593_v41 = vcombine.low %v433_v36, %v2179_v38  ;;  %v1908_v0 = vld [vmem:[%s2394_s3 + $0x170] sm:$0xff]   ;;  %v1912_v6 = vld [vmem:[%s2394_s3 + $0x168] sm:$0xff]   ;;  %v444_v7 = vunpack.c.l.bf16 %v436_v61  ;;  %v1916_v12 = vld [vmem:[%s2394_s3 + $0x160] sm:$0xff]   ;;  %s1587_s12 = sshll.u32 %s387_s13, 2 }
  0x1d   : > { %1696 = vmatpush3.bf16.msra.mxu0 %v1885_v14  ;;  %v424_v47 = vmul.f32 %v423_v43, %v421_v34  ;;  %v425_v48 = vmul.f32 %v423_v43, %v422_v35  ;;  %v1910_v2 = vld [vmem:[%s2394_s3 + $0x1f0] sm:$0xff]   ;;  %v1914_v8 = vld [vmem:[%s2394_s3 + $0x1e8] sm:$0xff]   ;;  %v464_v11 = vrot.slane %v443_v5, 1  ;;  %v1918_v14 = vld [vmem:[%s2394_s3 + $0x1e0] sm:$0xff]   ;;  %s389_s14 = scalar_lea.vmem %s2393_s2, %s1587_s12 }
  0x1e   : > { %1724 = vmatpush3.bf16.msra.mxu1 %v1886_v15  ;;  %1697 = vmatprep.subr.bf16.mxu0 %v1887_v16  ;;  %v461_v44 = vrot.slane %v441_v39, 1  ;;  %v462_v45 = vrot.slane %v442_v40, 1  ;;  %v478_v46 = vrot.slane %v441_v39, 2  ;;  %v479_v49 = vrot.slane %v442_v40, 2  ;;  %v1909_v3 = vld [vmem:[%s2394_s3 + $0x130] sm:$0xff]   ;;  %v1913_v9 = vld [vmem:[%s2394_s3 + $0x128] sm:$0xff]  }
  0x1f   : > { %1725 = vmatprep.subr.bf16.mxu1 %v1888_v17  ;;  %1183 = vmatprep.mubr.bf16.mxu1 %v1593_v41  ;;  %v458_v51 = vrot.slane %v424_v47, 1  ;;  %v459_v52 = vrot.slane %v425_v48, 1  ;;  %v475_v54 = vrot.slane %v424_v47, 2  ;;  %v476_v55 = vrot.slane %v425_v48, 2  ;;  %v1911_v4 = vld [vmem:[%s2394_s3 + $0x1b0] sm:$0xff]   ;;  %v1915_v10 = vld [vmem:[%s2394_s3 + $0x1a8] sm:$0xff]  }
  0x20   : > { %v2190_v53 = vsel %vm457_vm0, %v461_v44, %v462_v45  ;;  %v2193_v56 = vsel %vm474_vm1, %v478_v46, %v479_v49  ;;  %v511_v59 = vpack.c.bf16 %v441_v39, %v424_v47  ;;  %v465_v13 = vrot.slane %v444_v7, 1  ;;  %v1917_v15 = vld [vmem:[%s2394_s3 + $0x120] sm:$0xff]   ;;  %v1925_v34 = vld [vmem:[%s2394_s3 + $0x198] sm:$0xff]   ;;  %v1926_v39 = vld [vmem:[%s2394_s3 + $0x150] sm:$0xff]   ;;  %s417_s8 = scalar_select %p416_p11, 1, 0 }
  0x21   : > { %1698 = vmatpush3.bf16.msra.mxu0 %v1889_v18  ;;  %v460_v58 = vsel %vm457_vm0, %v458_v51, %v459_v52  ;;  %v477_v63 = vsel %vm474_vm1, %v475_v54, %v476_v55  ;;  %v1919_v16 = vld [vmem:[%s2394_s3 + $0x1a0] sm:$0xff]   ;;  %v481_v17 = vrot.slane %v443_v5, 2  ;;  %v1920_v18 = vld [vmem:[%s2394_s3 + $0x158] sm:$0xff]   ;;  %v1929_v44 = vld [vmem:[%s2394_s3 + $0x190] sm:$0xff]  }
  0x22   : > { %1726 = vmatpush3.bf16.msra.mxu1 %v1890_v19  ;;  %1699 = vmatprep.subr.bf16.mxu0 %v1891_v20  ;;  %v512_v62 = vpack.c.bf16 %v2190_v53, %v460_v58  ;;  %v513_v1 = vpack.c.bf16 %v2193_v56, %v477_v63  ;;  %v437_v19 = vld [vmem:[%s2171_s15 + $0x10] sm:$0xf]  ;;  %v482_v20 = vrot.slane %v444_v7, 2  ;;  %v1930_v45 = vld [vmem:[%s2394_s3 + $0x148] sm:$0xff]   ;;  %v426_v49 = vld [vmem:[%s389_s14] sm:$0xf]  ;;  %s418_s17 = scvt.s32.f32 %s417_s8 }
  0x23   : > { %1727 = vmatprep.subr.bf16.mxu1 %v1892_v21  ;;  %v438_v21 = vld [vmem:[%s2171_s15 + $0x14] sm:$0x1]  ;;  %v2278_v36 = vcombine.low %v2179_v38, %v437_v19  ;;  %v1931_v46 = vld [vmem:[%s2394_s3 + $0x108] sm:$0xff]   ;;  %v1935_v52 = vld [vmem:[%s2394_s3 + $0x100] sm:$0xff]  }
  0x24   : > { %1134 = vmatprep.mubr.bf16.mxu0 %v512_v62  ;;  %v483_v32 = vsel %vm474_vm1, %v481_v17, %v482_v20  ;;  %v1928_v38 = vld [vmem:[%s2394_s3 + $0x1d0] sm:$0xff]   ;;  %v1932_v47 = vld [vmem:[%s2394_s3 + $0x1c8] sm:$0xff]   ;;  %v1936_v54 = vld [vmem:[%s2394_s3 + $0x1c0] sm:$0xff]  }
  0x25   : > { %1700 = vmatpush3.bf16.msra.mxu0 %v1893_v22  ;;  %v445_v22 = vunpack.c.l.bf16 %v437_v19  ;;  %v516_v43 = vpack.c.bf16 %v483_v32, %v2193_v56  ;;  %v1933_v48 = vld [vmem:[%s2394_s3 + $0x188] sm:$0xff]   ;;  %v1938_v55 = vld [vmem:[%s2394_s3 + $0x238] sm:$0xff]   ;;  %v427_v56 = vld [vmem:[%s389_s14 + $0x4] sm:$0x1] }
  0x26   : > { %1728 = vmatpush3.bf16.msra.mxu1 %v1894_v23  ;;  %1701 = vmatprep.subr.bf16.mxu0 %v1895_v24  ;;  %v439_v23 = vld [vmem:[%s2171_s15 + $0x18] sm:$0xf]  ;;  %v446_v24 = vunpack.c.l.bf16 %v438_v21  ;;  %v1937_v58 = vld [vmem:[%s2394_s3 + $0x180] sm:$0xff]  }
  0x27   : > { %1729 = vmatprep.subr.bf16.mxu1 %v1896_v25  ;;  %v1595_v25 = vcombine.low %v437_v19, %v439_v23  ;;  %v447_v51 = vunpack.c.l.bf16 %v439_v23  ;;  %v1942_v17 = vld [vmem:[%s2394_s3 + $0x218] sm:$0xff]   ;;  %v1944_v19 = vld [vmem:[%s2394_s3 + $0x208] sm:$0xff]  }
  0x28   : > { %v485_v33 = vrot.slane %v446_v24, 2 }
  0x29   : > { %1702 = vmatpush3.bf16.msra.mxu0 %v1897_v26  ;;  %v1923_v26 = vld [vmem:[%s2394_s3 + $0x1d8] sm:$0xff]   ;;  %v497_v62 = vrot.slane %v447_v51, 2 }
  0x2a   : > { %1730 = vmatpush3.bf16.msra.mxu1 %v1898_v27  ;;  %1703 = vmatprep.subr.bf16.mxu0 %v1899_v28  ;;  %v1921_v27 = vld [vmem:[%s2394_s3 + $0x118] sm:$0xff]   ;;  %v467_v28 = vrot.slane %v445_v22, 1 }
  0x2b   : > { %1731 = vmatprep.subr.bf16.mxu1 %v1900_v29  ;;  %v484_v29 = vrot.slane %v445_v22, 2  ;;  %v1945_v22 = vld [vmem:[%s2394_s3 + $0x200] sm:$0xff]  }
  0x2d   : > { %1704 = vmatpush3.bf16.msra.mxu0 %v1901_v30  ;;  %v2267_v30 = vsel %vm457_vm0, %v464_v11, %v465_v13  ;;  %v2281_v37 = vsel %vm474_vm1, %v484_v29, %v485_v33  ;;  %v1940_v11 = vld [vmem:[%s2394_s3 + $0x228] sm:$0xff]  }
  0x2e   : > { %1732 = vmatpush3.bf16.msra.mxu1 %v1902_v31  ;;  %1745 = vmatprep.subr.bf16.mxu0 %v1904_v42  ;;  %v468_v31 = vrot.slane %v446_v24, 1  ;;  %v2289_v41 = vpack.c.bf16 %v2281_v37, %v483_v32  ;;  %v1927_v42 = vld [vmem:[%s2394_s3 + $0x110] sm:$0xff]   ;;  %v515_v63 = vpack.c.bf16 %v2267_v30, %v2190_v53 }
  0x2f   : > { %1773 = vmatprep.subr.bf16.mxu1 %v1906_v50  ;;  %v1934_v50 = vld [vmem:[%s2394_s3 + $0x140] sm:$0xff]  }
  0x30   : > { %1135 = vmatmul.mubr.bf16.vlgmr.msra.gmra.mxu0 %v511_v59  ;;  %v2275_v35 = vsel %vm457_vm0, %v467_v28, %v468_v31  ;;  %v428_v59 = vunpack.c.l.bf16 %v426_v49 }
  0x31   : > { %1184 = vmatmul.mubr.bf16.vlgmr.msra.gmra.mxu1 %v513_v1  ;;  %1746 = vmatpush3.bf16.msra.mxu0 %v1905_v57  ;;  %v518_v40 = vpack.c.bf16 %v2275_v35, %v2267_v30  ;;  %v440_v57 = vld [vmem:[%s2171_s15 + $0x1c] sm:$0x1] }
  0x32   : > { %1774 = vmatpush3.bf16.msra.mxu1 %v1907_v60  ;;  %1747 = vmatprep.subr.bf16.mxu0 %v1908_v0  ;;  %v429_v60 = vunpack.c.l.bf16 %v427_v56  ;;  %v448_v61 = vunpack.c.l.bf16 %v440_v57  ;;  %v493_v0 = vrot.slane %v447_v51, 1 }
  0x33   : > { %1775 = vmatprep.subr.bf16.mxu1 %v1910_v2  ;;  %1191 = vmatprep.mubr.bf16.mxu1 %v1595_v25 }
  0x34   : > { %1142 = vmatprep.mubr.bf16.mxu0 %v518_v40  ;;  %v498_v1 = vrot.slane %v448_v61, 2  ;;  %v494_v2 = vrot.slane %v448_v61, 1 }
  0x35   : > { %1748 = vmatpush3.bf16.msra.mxu0 %v1909_v3  ;;  %v1939_v3 = vld [vmem:[%s2394_s3 + $0x230] sm:$0xff]  }
  0x36   : > { %1776 = vmatpush3.bf16.msra.mxu1 %v1911_v4  ;;  %1749 = vmatprep.subr.bf16.mxu0 %v1912_v6  ;;  %v430_v4 = vstv %s418_s17  ;;  %v499_v7 = vsel %vm474_vm1, %v497_v62, %v498_v1  ;;  %s400_s17 = sadd.s32 %s1589_s10, %s2117_s6  ;;  %s1591_s6 = sshll.u32 %s1972_s19, 1 }
  0x37   : > { %1777 = vmatprep.subr.bf16.mxu1 %v1914_v8  ;;  %v431_v5 = vmul.f32 %v430_v4, %v428_v59  ;;  %v432_v6 = vmul.f32 %v430_v4, %v429_v60  ;;  %v522_v53 = vpack.c.bf16 %v499_v7, %v2281_v37  ;;  %v495_v8 = vsel %vm457_vm0, %v493_v0, %v494_v2  ;;  %s1590_s15 = sshll.u32 %s400_s17, 2  ;;  %s405_s29 = sadd.s32 %s1968_s18, %s1591_s6 }
  0x38   : > { %1143 = vmatmul.mubr.bf16.gmra.mxu0 %v2278_v36  ;;  %v521_v13 = vpack.c.bf16 %v495_v8, %v2275_v35  ;;  %s402_s16 = scalar_lea.vmem %s2395_s4, %s1590_s15  ;;  %p406_p12 = scmp.lt.s32.totalorder %s405_s29, 3 }
  0x39   : > { %1750 = vmatpush3.bf16.msra.mxu0 %v1913_v9  ;;  %1192 = vmatmul.mubr.bf16.gmra.mxu1 %v2289_v41  ;;  %v503_v9 = vrot.slane %v431_v5, 1  ;;  %v507_v20 = vrot.slane %v431_v5, 2  ;;  %v508_v21 = vrot.slane %v432_v6, 2 }
  0x3a   : > { %1778 = vmatpush3.bf16.msra.mxu1 %v1915_v10  ;;  %1751 = vmatprep.subr.bf16.mxu0 %v1916_v12  ;;  %v504_v10 = vrot.slane %v432_v6, 1  ;;  %s2415_s29 = smov (!%p406_p12, %s405_s29), 3 }
  0x3b   : > { %1779 = vmatprep.subr.bf16.mxu1 %v1918_v14  ;;  %1232 = vmatprep.mubr.bf16.mxu0 %v516_v43  ;;  %v509_v23 = vsel %vm474_vm1, %v507_v20, %v508_v21  ;;  %s1592_s19 = sshll.u32 %s2415_s29, 3 }
  0x3c   : > { %1281 = vmatprep.mubr.bf16.mxu1 %v518_v40  ;;  %v505_v12 = vsel %vm457_vm0, %v503_v9, %v504_v10  ;;  %v525_v24 = vpack.c.bf16 %v509_v23, %v499_v7  ;;  %s409_s7 = scalar_lea.vmem %s2396_s5, %s1592_s19 }
  0x3d   : > { %1752 = vmatpush3.bf16.msra.mxu0 %v1917_v15  ;;  %v524_v14 = vpack.c.bf16 %v505_v12, %v495_v8  ;;  %v523_v15 = vpack.c.bf16 %v431_v5, %v447_v51 }
  0x3e   : > { %1780 = vmatpush3.bf16.msra.mxu1 %v1919_v16  ;;  %1753 = vmatprep.subr.bf16.mxu0 %v1920_v18  ;;  %v1941_v16 = vld [vmem:[%s2394_s3 + $0x220] sm:$0xff]   ;;  %v1943_v18 = vld [vmem:[%s2394_s3 + $0x210] sm:$0xff]  }
  0x3f   : > { %1781 = vmatprep.subr.bf16.mxu1 %v1923_v26 }
  0x41   : > { %1754 = vmatpush3.bf16.msra.mxu0 %v1921_v27 }
  0x42   : > { %1782 = vmatpush3.bf16.msra.mxu1 %v1925_v34  ;;  %1755 = vmatprep.subr.bf16.mxu0 %v1926_v39 }
  0x43   : > { %1783 = vmatprep.subr.bf16.mxu1 %v1928_v38 }
  0x45   : > { %1756 = vmatpush3.bf16.msra.mxu0 %v1927_v42 }
  0x46   : > { %1757 = vmatprep.subr.bf16.mxu0 %v1930_v45  ;;  %1784 = vmatpush3.bf16.msra.mxu1 %v1929_v44 }
  0x47   : > { %1785 = vmatprep.subr.bf16.mxu1 %v1932_v47 }
  0x49   : > { %1758 = vmatpush3.bf16.msra.mxu0 %v1931_v46 }
  0x4a   : > { %1759 = vmatprep.subr.bf16.mxu0 %v1934_v50  ;;  %1786 = vmatpush3.bf16.msra.mxu1 %v1933_v48 }
  0x4b   : > { %1787 = vmatprep.subr.bf16.mxu1 %v1936_v54 }
  0x4d   : > { %1760 = vmatpush3.bf16.msra.mxu0 %v1935_v52 }
  0x4e   : > { %1811 = vmatprep.subr.bf16.mxu0 %v1938_v55  ;;  %1788 = vmatpush3.bf16.msra.mxu1 %v1937_v58 }
  0x50   : > { %1233 = vmatmul.mubr.bf16.vlgmr.msra.gmra.mxu0 %v515_v63 }
  0x51   : > { %1812 = vmatpush3.bf16.msra.mxu0 %v1938_v55  ;;  %1282 = vmatmul.mubr.bf16.vlgmr.msra.gmra.mxu1 %v2278_v36 }
  0x52   : > { %1813 = vmatprep.subr.bf16.mxu0 %v1939_v3  ;;  %1240 = vmatprep.mubr.bf16.mxu0 %v522_v53 }
  0x53   : > { %1289 = vmatprep.mubr.bf16.mxu1 %v524_v14 }
  0x55   : > { %1814 = vmatpush3.bf16.msra.mxu0 %v1939_v3 }
  0x56   : > { %1815 = vmatprep.subr.bf16.mxu0 %v1940_v11 }
  0x58   : > { %1241 = vmatmul.mubr.bf16.gmra.mxu0 %v521_v13 }
  0x59   : > { %1816 = vmatpush3.bf16.msra.mxu0 %v1940_v11  ;;  %1827 = vmatprep.mubr.bf16.mxu0 %v2289_v41 }
  0x5a   : > { %1290 = vmatmul.mubr.bf16.gmra.mxu1 %v523_v15  ;;  %1817 = vmatprep.subr.bf16.mxu0 %v1941_v16 }
  0x5d   : > { %1818 = vmatpush3.bf16.msra.mxu0 %v1941_v16 }
  0x5e   : > { %1819 = vmatprep.subr.bf16.mxu0 %v1942_v17 }
  0x61   : > { %1820 = vmatpush3.bf16.msra.mxu0 %v1942_v17 }
  0x62   : > { %1821 = vmatprep.subr.bf16.mxu0 %v1943_v18 }
  0x65   : > { %1822 = vmatpush3.bf16.msra.mxu0 %v1943_v18 }
  0x66   : > { %1823 = vmatprep.subr.bf16.mxu0 %v1944_v19 }
  0x69   : > { %1824 = vmatpush3.bf16.msra.mxu0 %v1944_v19 }
  0x6a   : > { %1825 = vmatprep.subr.bf16.mxu0 %v1945_v22 }
  0x6d   : > { %1826 = vmatpush3.bf16.msra.mxu0 %v1945_v22 }
  0x70   : > { %1828 = vmatmul.mubr.bf16.vlgmr.msra.gmra.mxu0 %v525_v24 }
  0xf0   : > { %v1705_v25 = vpop.f32.mrf.mxu0 }
  0xf1   : > { %v1733_v26 = vpop.f32.mrf.mxu1 }
  0xf2   : > { %v1706_v27 = vpop.f32.mrf.mxu0 }
  0xf3   : > { %v1734_v28 = vpop.f32.mrf.mxu1  ;;  %v1707_v55 = vadd.f32 %v1706_v27, %v1705_v25 }
  0xf4   : > { %v1708_v29 = vpop.f32.mrf.mxu0  ;;  %v1735_v56 = vadd.f32 %v1734_v28, %v1733_v26 }
  0xf5   : > { %v1736_v30 = vpop.f32.mrf.mxu1 }
  0xf6   : > { %v1709_v31 = vpop.f32.mrf.mxu0  ;;  %v1186_v4 = vadd.f32 %v1735_v56, %v1707_v55 }
  0xf7   : > { %v1737_v32 = vpop.f32.mrf.mxu1  ;;  %v1710_v63 = vadd.f32 %v1709_v31, %v1708_v29 }
  0xf8   : > { %v1711_v33 = vpop.f32.mrf.mxu0  ;;  %v1738_v0 = vadd.f32 %v1737_v32, %v1736_v30 }
  0xf9   : > { %v1739_v34 = vpop.f32.mrf.mxu1 }
  0xfa   : > { %v1712_v35 = vpop.f32.mrf.mxu0  ;;  %v1189_v8 = vadd.f32 %v1738_v0, %v1710_v63 }
  0xfb   : > { %v1740_v36 = vpop.f32.mrf.mxu1  ;;  %v1713_v59 = vadd.f32 %v1712_v35, %v1711_v33 }
  0xfc   : > { %v1714_v37 = vpop.f32.mrf.mxu0  ;;  %v1741_v60 = vadd.f32 %v1740_v36, %v1739_v34 }
  0xfd   : > { %v1742_v39 = vpop.f32.mrf.mxu1 }
  0xfe   : > { %v1715_v40 = vpop.f32.mrf.mxu0  ;;  %v1194_v6 = vadd.f32 %v1741_v60, %v1713_v59 }
  0xff   : > { %v1743_v41 = vpop.f32.mrf.mxu1  ;;  %v1716_v61 = vadd.f32 %v1715_v40, %v1714_v37 }
 0x100   : > { %v1744_v62 = vadd.f32 %v1743_v41, %v1742_v39 }
 0x102   : > { %v1197_v7 = vadd.f32 %v1744_v62, %v1716_v61 }
 0x110   : > { %v1761_v42 = vpop.f32.mrf.mxu0 }
 0x111   : > { %v1789_v43 = vpop.f32.mrf.mxu1 }
 0x112   : > { %v1762_v38 = vpop.f32.mrf.mxu0 }
 0x113   : > { %v1790_v45 = vpop.f32.mrf.mxu1  ;;  %v1763_v1 = vadd.f32 %v1762_v38, %v1761_v42 }
 0x114   : > { %v1764_v44 = vpop.f32.mrf.mxu0  ;;  %v1791_v10 = vadd.f32 %v1790_v45, %v1789_v43 }
 0x115   : > { %v1792_v47 = vpop.f32.mrf.mxu1  ;;  %v1235_v9 = vadd.f32 %v1763_v1, %v1186_v4 }
 0x116   : > { %v1765_v46 = vpop.f32.mrf.mxu0 }
 0x117   : > { %v1793_v49 = vpop.f32.mrf.mxu1  ;;  %v1766_v53 = vadd.f32 %v1765_v46, %v1764_v44  ;;  %v1284_v20 = vadd.f32 %v1791_v10, %v1235_v9 }
 0x118   : > { %v1767_v48 = vpop.f32.mrf.mxu0  ;;  %v1794_v17 = vadd.f32 %v1793_v49, %v1792_v47 }
 0x119   : > { %v1238_v16 = vadd.f32 %v1766_v53, %v1189_v8 }
 0x11a   : > { %v1768_v50 = vpop.f32.mrf.mxu0  ;;  %v1795_v51 = vpop.f32.mrf.mxu1 }
 0x11b   : > { %v1769_v2 = vadd.f32 %v1768_v50, %v1767_v48  ;;  %v1287_v26 = vadd.f32 %v1794_v17, %v1238_v16 }
 0x11c   : > { %v1770_v52 = vpop.f32.mrf.mxu0  ;;  %v1796_v54 = vpop.f32.mrf.mxu1 }
 0x11d   : > { %v1243_v11 = vadd.f32 %v1769_v2, %v1194_v6  ;;  %v1797_v12 = vadd.f32 %v1796_v54, %v1795_v51 }
 0x11e   : > { %v1771_v57 = vpop.f32.mrf.mxu0  ;;  %v1798_v58 = vpop.f32.mrf.mxu1 }
 0x11f   : > { %v1772_v3 = vadd.f32 %v1771_v57, %v1770_v52  ;;  %v1292_v19 = vadd.f32 %v1797_v12, %v1243_v11 }
 0x120   : > { %v1799_v5 = vpop.f32.mrf.mxu1 }
 0x121   : > { %v1246_v13 = vadd.f32 %v1772_v3, %v1197_v7  ;;  %v1800_v14 = vadd.f32 %v1799_v5, %v1798_v58 }
 0x123   : > { %v1295_v21 = vadd.f32 %v1800_v14, %v1246_v13 }
 0x130   : > { %v1829_v15 = vpop.f32.mrf.mxu0 }
 0x131   : > { %v1341_v23 = vadd.f32 %v1829_v15, %v1292_v19 }
 0x132   : > { %v1332_v18 = vpop.f32.mrf.mxu0 }
 0x133   : > { %v1333_v24 = vadd.f32 %v1332_v18, %v1284_v20  ;;  %v1366_v34 = vmul.f32 %v1341_v23, %v1341_v23 }
 0x134   : > { %v1830_v22 = vpop.f32.mrf.mxu0 }
 0x135   : > { %v1344_v25 = vadd.f32 %v1830_v22, %v1295_v21  ;;  %v1364_v30 = vmul.f32 %v1333_v24, %v1333_v24 }
 0x136   : > { %v1335_v27 = vpop.f32.mrf.mxu0 }
 0x137   : > { %v1686_v28 = vpack.c.bf16 %v1344_v25, %v1341_v23  ;;  %v1336_v29 = vadd.f32 %v1335_v27, %v1287_v26  ;;  %v1367_v37 = vmul.f32 %v1344_v25, %v1344_v25 }
 0x139   : > { %1688 = vst [vmem:[%s402_s16 + $0x8] sm:$0xff] %v1686_v28   ;;  %v1681_v31 = vpack.c.bf16 %v1336_v29, %v1333_v24  ;;  %v1355_v32 = vadd.f32 %v1336_v29, %v1333_v24  ;;  %v1365_v33 = vmul.f32 %v1336_v29, %v1336_v29 }
 0x13b   : > { %1682 = vst [vmem:[%s402_s16] sm:$0xff] %v1681_v31   ;;  %v1356_v35 = vadd.f32 %v1355_v32, %v1341_v23  ;;  %v1368_v36 = vadd.f32 %v1365_v33, %v1364_v30 }
 0x13d   : > { %v1357_v39 = vadd.f32 %v1356_v35, %v1344_v25  ;;  %v1369_v40 = vadd.f32 %v1368_v36, %v1366_v34 }
 0x13f   : > { %v1358_v41 = vrot.slane %v1357_v39, 4  ;;  %v1370_v42 = vadd.f32 %v1369_v40, %v1367_v37 }
 0x141   : > { %v1359_v38 = vadd.f32 %v1358_v41, %v1357_v39  ;;  %v1371_v43 = vrot.slane %v1370_v42, 4 }
 0x143   : > { %v1360_v44 = vrot.slane %v1359_v38, 2  ;;  %v1372_v45 = vadd.f32 %v1371_v43, %v1370_v42 }
 0x145   : > { %v1361_v46 = vadd.f32 %v1360_v44, %v1359_v38  ;;  %v1373_v47 = vrot.slane %v1372_v45, 2 }
 0x147   : > { %v1362_v48 = vrot.slane %v1361_v46, 1  ;;  %v1374_v49 = vadd.f32 %v1373_v47, %v1372_v45 }
 0x149   : > { %v1375_v50 = vrot.slane %v1374_v49, 1  ;;  %v1363_v51 = vadd.f32 %v1362_v48, %v1361_v46 }
 0x14b   : > { %v1376_v52 = vadd.f32 %v1375_v50, %v1374_v49 }
 0x14d   : > { %v1378_v54 = vsel %vm1377_vm2, %v1363_v51, %v1376_v52 }
 0x14e   : > { %v1380_v55 = vsel %vm1379_vm3, %v1378_v54, 0.0 }
 0x14f   : > { %1381 = vst [vmem:[%s409_s7] sm:$0xff] %v1380_v55 }
 0x150 PF: > { %s16_s22 = sadd.s32 1, %s1984_s22   ;;  %s2398_s18 = smov %s1976_s20 }
 0x151   : > { %p13_p13 = scmp.ge.s32.totalorder %s16_s22, 6   ;;  %s2399_s19 = smov %s1980_s21 }
 0x152   : > { %s2400_s20 = smov %s2403_s23  ;;  %s2401_s21 = smov %s2407_s24 }
 0x153   :  { %15 = sbr.rel (!%p13_p13) target bundleno = 3 (0x3), region = 84 }

</bundles_post_ra>
